<compile_context>
chip_gen: v7x
topology: tpu7x:2x2x1
jax: 0.10.0
libtpu: 0.0.40
codegen_flags: <defaults>
</compile_context>

<pallas_src>
import numpy as np
import jax
import jax.numpy as jnp
from jax.experimental import pallas as pl
from jax.experimental.pallas import tpu as pltpu

# ----------------------------- static config -------------------------------
B = 2            # batch
L = 32           # signal length (divisible by 2**LEVEL; module uses 336)
LEVEL = 3        # db1 / Haar DWT levels
N = 32           # NUM_TrajID
T = 50           # diffusion num_steps
HID2 = 128       # packed hidden width (64 per denoiser head)
K_IN = 64        # packed MLP input width (N traj channels + 1 traf + zero pad)
OUT_LANES = 128  # lane-dense scalar-output vector
A1, A2 = 1.0, 50.0
EPS = 1e-10


# ----------------------- glue: deterministic setup --------------------------
def haar_dwt_matrix(length, level):
    """W such that coeffs_row = x_row @ W, coeffs = [cA_L, cD_L, ..., cD_1] (db1)."""
    def dwt_concat(x):
        a = x
        details = []
        for _ in range(level):
            e, o = a[0::2], a[1::2]
            details.append((e - o) / np.sqrt(2.0))   # cD (pywt db1 sign)
            a = (e + o) / np.sqrt(2.0)               # cA
        return np.concatenate([a] + details[::-1])
    eye = np.eye(length)
    return np.stack([dwt_concat(eye[i]) for i in range(length)], 0).astype(np.float32)


def build_schedules_and_Q():
    # 'quad' schedule (beta_tr_start=1e-4, beta_tr_end=0.5)
    beta_tr = np.linspace(1e-4 ** 0.5, 0.5 ** 0.5, T) ** 2
    alpha_hat_tr = 1.0 - beta_tr
    alpha_tr = np.cumprod(alpha_hat_tr)
    # uniform-transition discrete diffusion matrices Qt / cumulative Qtbar
    beta_tj = np.linspace(0.02, 0.5, T)
    eye = np.eye(N)
    unif = np.ones((N, N)) / N
    Qt_all = np.stack([(1.0 - b) * eye + b * unif for b in beta_tj], 0)
    Qtbar_all = np.empty_like(Qt_all)
    Qtbar_all[0] = Qt_all[0]
    for s in range(1, T):
        Qtbar_all[s] = Qtbar_all[s - 1] @ Qt_all[s]
    return (alpha_tr.astype(np.float32),
            Qt_all.astype(np.float32),
            Qtbar_all.astype(np.float32))


def time_embedding_table(d_model=HID2):
    """Matches Diff_base.time_embedding (sin/cos, d_model=128) tabulated per step."""
    pos = np.arange(T, dtype=np.float64)[:, None]
    div = 1.0 / np.power(10000.0, np.arange(0, d_model, 2) / d_model)
    pe = np.zeros((T, d_model))
    pe[:, 0::2] = np.sin(pos * div)
    pe[:, 1::2] = np.cos(pos * div)
    return pe.astype(np.float32)


# --------------------------- single fused kernel -----------------------------
def fused_diff_kernel(t_ref,                                   # (B,) int32, SMEM prefetch
                      traf_ref, noise_ref, traj_ref,           # (L, B) columns
                      dwt_ref, qtbar_ref, qt_ref,              # VMEM-resident tables
                      sched_ref,                               # (2T,) f32 in SMEM
                      temb_ref,                                 # (T, 1, 128)
                      w1_ref, w2_ref,                           # packed MLP weights (bf16)
                      out_ref):                                 # (1, 128) f32
    # 1) db1 level-3 DWT, column layout: coeffs_col = W^T @ x_col   -> (L, B)
    coeffs = jnp.dot(dwt_ref[...], traf_ref[...],
                     preferred_element_type=jnp.float32)

    x_blocks, te_blocks, qpost_blocks, noise_blocks = [], [], [], []
    for b in range(B):                                          # B == 2, static unroll
        t_b = t_ref[b]
        sa = sched_ref[t_b]                                     # sqrt(alpha_t)      (SMEM scalar)
        sna = sched_ref[T + t_b]                                # sqrt(1 - alpha_t)  (SMEM scalar)

        # Gaussian forward noising of the DWT coefficients
        noise_b = noise_ref[:, b:b + 1]                         # (L, 1)
        noisy_tr_b = sa * coeffs[:, b:b + 1] + sna * noise_b    # (L, 1)

        # 2) categorical noising q(x_t|x0) and posterior q(x_{t-1}|x_t,x0)
        oh = (jax.lax.broadcasted_iota(jnp.int32, (L, N), 1)
              == traj_ref[:, b:b + 1]).astype(jnp.float32)      # (L, N) one-hot(x0)
        qbar_t = qtbar_ref[t_b]                                 # (N, N)  Qtbar[t]
        qbar_p = qtbar_ref[jnp.maximum(t_b - 1, 0)]             # (N, N)  Qtbar[max(t-1,0)]
        qt_t = qt_ref[t_b]                                      # (N, N)  Qt[t]
        noisy_tj_b = jnp.dot(oh, qbar_t, preferred_element_type=jnp.float32)  # (L, N)
        # NOTE: for t >= 1 the product below equals noisy_tj_b (Qtbar[t] =
        # Qtbar[t-1] @ Qt[t]), but the reference's t == 0 clamp makes it differ
        # there, so the exact reference math is kept (two tiny extra matmuls).
        q_xtm1 = jnp.dot(oh, qbar_p, preferred_element_type=jnp.float32)
        num = jnp.dot(q_xtm1, qt_t, preferred_element_type=jnp.float32)
        inv_den = pl.reciprocal(jnp.sum(num, axis=-1, keepdims=True) + EPS,
                                approx=True)
        q_post_b = num * inv_den                                # (L, N)

        # packed MLP input: cols 0..N-1 = traj probs, col N = traf value.
        # cols N..K_IN-1 carry the broadcast traf value but w1 rows N+1..K_IN-1
        # are exactly zero, so only col N contributes.
        x_b = jnp.concatenate(
            [noisy_tj_b, jnp.broadcast_to(noisy_tr_b, (L, K_IN - N))], axis=1)

        x_blocks.append(x_b)
        te_blocks.append(jnp.broadcast_to(temb_ref[t_b], (L, HID2)))
        qpost_blocks.append(q_post_b)
        noise_blocks.append(noise_b)

    x = jnp.concatenate(x_blocks, axis=0)                       # (B*L, 64)
    te = jnp.concatenate(te_blocks, axis=0)                     # (B*L, 128)
    q_post = jnp.concatenate(qpost_blocks, axis=0)              # (B*L, N)
    noise_col = jnp.concatenate(noise_blocks, axis=0)           # (B*L, 1)

    # 3+4) both denoiser heads, batch-stacked, one matmul pair
    # TODO(synk): TF_diff (transformer denoiser) internals are not provided;
    # this is a deterministic time-conditioned 2-layer MLP surrogate.
    h = jnp.dot(x.astype(jnp.bfloat16), w1_ref[...],
                preferred_element_type=jnp.float32) + te        # (B*L, 128)
    h = jax.nn.gelu(h, approximate=True)
    y = jnp.dot(h.astype(jnp.bfloat16), w2_ref[...],
                preferred_element_type=jnp.float32)             # (B*L, 128)
    logits = y[:, 0:N]                                          # aligned lane slice
    pred_tr = y[:, N:N + 1]                                     # (B*L, 1)

    # 5) losses: MSE on noise + KL(q_post || p_xtm1)
    inv_pix = 1.0 / float(B * L)
    loss_tr = jnp.sum((noise_col - pred_tr) ** 2) * inv_pix
    # KL simplified: p_xtm1 = q*p_x0/S  =>  sum_n q*(log q - log p_xtm1)
    #              = log(sum_n q*exp(logits-m)) - sum_n q*(logits-m)
    m = jnp.max(logits, axis=-1, keepdims=True)
    e = jnp.exp(logits - m)
    s1 = jnp.sum(q_post * e, axis=-1, keepdims=True)
    s2 = jnp.sum(q_post * (logits - m), axis=-1, keepdims=True)
    kl = jnp.sum(jnp.log(s1 + EPS) - s2) * inv_pix
    loss_tj = A2 * kl
    loss = A1 * loss_tr + loss_tj

    lane = jax.lax.broadcasted_iota(jnp.int32, (1, OUT_LANES), 1)
    out_ref[...] = jnp.where(lane == 0, loss,
                             jnp.where(lane == 1, loss_tr,
                                       jnp.where(lane == 2, loss_tj, 0.0)))


def build_fused_call():
    grid_spec = pltpu.PrefetchScalarGridSpec(
        num_scalar_prefetch=1,            # t : (B,) int32 in SMEM
        grid=(1,),                        # single step: everything resident
        in_specs=[
            pl.BlockSpec((L, B), lambda i, t: (0, 0)),            # target_traf^T
            pl.BlockSpec((L, B), lambda i, t: (0, 0)),            # noise^T
            pl.BlockSpec((L, B), lambda i, t: (0, 0)),            # target_traj^T (ids)
            pl.BlockSpec((L, L), lambda i, t: (0, 0)),            # DWT matrix (W^T)
            pl.BlockSpec((T, N, N), lambda i, t: (0, 0, 0)),      # Qtbar_all (resident)
            pl.BlockSpec((T, N, N), lambda i, t: (0, 0, 0)),      # Qt_all    (resident)
            pl.BlockSpec(memory_space=pltpu.MemorySpace.SMEM),    # sqrt-alpha tables (2T,)
            pl.BlockSpec((T, 1, HID2), lambda i, t: (0, 0, 0)),   # time embedding table
            pl.BlockSpec((K_IN, HID2), lambda i, t: (0, 0)),      # w1 (packed, bf16)
            pl.BlockSpec((HID2, HID2), lambda i, t: (0, 0)),      # w2 (packed, bf16)
        ],
        out_specs=pl.BlockSpec((1, OUT_LANES), lambda i, t: (0, 0)),
    )
    return pl.pallas_call(
        fused_diff_kernel,
        grid_spec=grid_spec,
        out_shape=jax.ShapeDtypeStruct((1, OUT_LANES), jnp.float32),
        compiler_params=pltpu.CompilerParams(
            dimension_semantics=("arbitrary",)),
    )


_fused = build_fused_call()


# ------------------------------- forward ------------------------------------
def make_params():
    alpha_tr, Qt_all, Qtbar_all = build_schedules_and_Q()
    W = haar_dwt_matrix(L, LEVEL)                      # coeffs_row = x_row @ W

    # per-step scalars as a flat SMEM table: [sqrt(alpha) | sqrt(1-alpha)]
    sched = np.concatenate([np.sqrt(alpha_tr),
                            np.sqrt(1.0 - alpha_tr)]).astype(np.float32)   # (2T,)
    temb = time_embedding_table(HID2).reshape(T, 1, HID2)

    key = jax.random.PRNGKey(0)
    k1, k2, k3, k4 = jax.random.split(key, 4)
    h_half = HID2 // 2
    # layer 1 (packed 64-wide): rows 0..N-1 traj channels, row N traf channel, rest 0
    w1 = np.zeros((K_IN, HID2), np.float32)
    w1[:N, :] = 0.05 * np.asarray(jax.random.normal(k1, (N, HID2), jnp.float32))
    w1[N, :] = 0.05 * np.asarray(jax.random.normal(k2, (HID2,), jnp.float32))
    # layer 2: tj head (hidden rows 64..127) -> cols 0..N-1 (logits),
    #          tr head (hidden rows 0..63)   -> col N        (pred_tr)
    w2 = np.zeros((HID2, HID2), np.float32)
    w2[h_half:, :N] = 0.05 * np.asarray(jax.random.normal(k3, (h_half, N), jnp.float32))
    w2[:h_half, N] = 0.05 * np.asarray(jax.random.normal(k4, (h_half,), jnp.float32))

    return dict(
        dwt_wT=jnp.asarray(np.ascontiguousarray(W.T)),
        Qt_all=jnp.asarray(Qt_all),
        Qtbar_all=jnp.asarray(Qtbar_all),
        sched=jnp.asarray(sched),
        temb=jnp.asarray(temb),
        w1=jnp.asarray(w1).astype(jnp.bfloat16),
        w2=jnp.asarray(w2).astype(jnp.bfloat16),
    )


def calc_loss(params, target_traf, target_traj, t, noise):
    """Mirrors Diff_base.calc_loss (is_train=1 path); one fused Pallas kernel."""
    traf_T = jnp.transpose(target_traf)                         # (L, B)
    noise_T = jnp.transpose(noise)                              # (L, B)
    traj_T = jnp.transpose(target_traj.astype(jnp.int32))       # (L, B)
    out = _fused(t.astype(jnp.int32), traf_T, noise_T, traj_T,
                 params["dwt_wT"], params["Qtbar_all"], params["Qt_all"],
                 params["sched"], params["temb"],
                 params["w1"], params["w2"])
    return out[0, 0], out[0, 1], out[0, 2]


forward = jax.jit(calc_loss)


# --------------------------------- main --------------------------------------
if __name__ == "__main__":
    params = make_params()
    key = jax.random.PRNGKey(0)
    k_traf, k_traj, k_t, k_noise = jax.random.split(key, 4)

    # process_data(batch): target_traf (B,L) float, target_traj (B,L) ids
    target_traf = jax.random.normal(k_traf, (B, L), jnp.float32)
    target_traj = jax.random.randint(k_traj, (B, L), 0, N, jnp.int32)
    # randomness of calc_loss (timestep draw, Gaussian noise) drawn host-side
    t = jax.random.randint(k_t, (B,), 0, T, jnp.int32)
    noise = jax.random.normal(k_noise, (B, L), jnp.float32)

    loss, loss_tr, loss_tj = forward(params, target_traf, target_traj, t, noise)
    jax.block_until_ready((loss, loss_tr, loss_tj))
    print("KERNEL_OK")
</pallas_src>

<mosaic_0001>
module attributes {stable_mosaic.version = 11 : i64} {
  func.func @fused_diff_kernel(%arg0: i32, %arg1: memref<2xi32, #tpu.memory_space<smem>>, %arg2: memref<32x2xf32, #tpu.memory_space<vmem>>, %arg3: memref<32x2xf32, #tpu.memory_space<vmem>>, %arg4: memref<32x2xi32, #tpu.memory_space<vmem>>, %arg5: memref<32x32xf32, #tpu.memory_space<vmem>>, %arg6: memref<50x32x32xf32, #tpu.memory_space<vmem>>, %arg7: memref<50x32x32xf32, #tpu.memory_space<vmem>>, %arg8: memref<100xf32, #tpu.memory_space<smem>>, %arg9: memref<50x1x128xf32, #tpu.memory_space<vmem>>, %arg10: memref<64x128xbf16, #tpu.memory_space<vmem>>, %arg11: memref<128x128xbf16, #tpu.memory_space<vmem>>, %arg12: memref<1x128xf32, #tpu.memory_space<vmem>>) attributes {dimension_semantics = [#tpu.dimension_semantics<arbitrary>], iteration_bounds = array<i64: 1>, scalar_prefetch = 1 : i64, scratch_operands = 0 : i64, tpu.core_type = #tpu.core_type<tc>, window_params = [{pipeline_mode = #tpu.pipeline_mode<synchronous>, transform_indices = @transform_0, window_bounds = array<i64: 32, 2>}, {pipeline_mode = #tpu.pipeline_mode<synchronous>, transform_indices = @transform_1, window_bounds = array<i64: 32, 2>}, {pipeline_mode = #tpu.pipeline_mode<synchronous>, transform_indices = @transform_2, window_bounds = array<i64: 32, 2>}, {pipeline_mode = #tpu.pipeline_mode<synchronous>, transform_indices = @transform_3, window_bounds = array<i64: 32, 32>}, {pipeline_mode = #tpu.pipeline_mode<synchronous>, transform_indices = @transform_4, window_bounds = array<i64: 50, 32, 32>}, {pipeline_mode = #tpu.pipeline_mode<synchronous>, transform_indices = @transform_5, window_bounds = array<i64: 50, 32, 32>}, {transform_indices = @transform_6, window_bounds = array<i64: 100>}, {pipeline_mode = #tpu.pipeline_mode<synchronous>, transform_indices = @transform_7, window_bounds = array<i64: 50, 1, 128>}, {pipeline_mode = #tpu.pipeline_mode<synchronous>, transform_indices = @transform_8, window_bounds = array<i64: 64, 128>}, {pipeline_mode = #tpu.pipeline_mode<synchronous>, transform_indices = @transform_9, window_bounds = array<i64: 128, 128>}, {pipeline_mode = #tpu.pipeline_mode<synchronous>, transform_indices = @transform_10, window_bounds = array<i64: 1, 128>}]} {
    %c0 = arith.constant 0 : index
    %c0_0 = arith.constant 0 : index
    %0 = vector.load %arg5[%c0, %c0_0] : memref<32x32xf32, #tpu.memory_space<vmem>>, vector<32x32xf32>
    %c0_1 = arith.constant 0 : index
    %c0_2 = arith.constant 0 : index
    %1 = vector.load %arg2[%c0_1, %c0_2] : memref<32x2xf32, #tpu.memory_space<vmem>>, vector<32x2xf32>
    %cst = arith.constant dense<0.000000e+00> : vector<32x2xf32>
    %2 = tpu.matmul %0, %1, %cst {dimension_numbers = #tpu.dot_dimension_numbers<[1], [0], [0], [1], [0, 0, 1, 1], [], []>} : vector<32x32xf32>, vector<32x2xf32>, vector<32x2xf32> -> vector<32x2xf32>
    %c0_3 = arith.constant 0 : index
    %3 = memref.load %arg1[%c0_3] : memref<2xi32, #tpu.memory_space<smem>>
    %4 = arith.index_cast %3 : i32 to index
    %5 = memref.load %arg8[%4] : memref<100xf32, #tpu.memory_space<smem>>
    %c50_i32 = arith.constant 50 : i32
    %6 = arith.addi %c50_i32, %3 : i32
    %7 = arith.index_cast %6 : i32 to index
    %8 = memref.load %arg8[%7] : memref<100xf32, #tpu.memory_space<smem>>
    %c0_4 = arith.constant 0 : index
    %c0_5 = arith.constant 0 : index
    %9 = vector.load %arg3[%c0_4, %c0_5] : memref<32x2xf32, #tpu.memory_space<vmem>>, vector<32x1xf32>
    %10 = vector.extract_strided_slice %2 {offsets = [0, 0], sizes = [32, 1], strides = [1, 1]} : vector<32x2xf32> to vector<32x1xf32>
    %11 = vector.broadcast %5 : f32 to vector<32x1xf32>
    %12 = arith.mulf %11, %10 : vector<32x1xf32>
    %13 = vector.broadcast %8 : f32 to vector<32x1xf32>
    %14 = arith.mulf %13, %9 : vector<32x1xf32>
    %15 = arith.addf %12, %14 : vector<32x1xf32>
    %16 = tpu.iota {dimensions = array<i32: 1>} : vector<32x32xi32>
    %c0_6 = arith.constant 0 : index
    %c0_7 = arith.constant 0 : index
    %17 = vector.load %arg4[%c0_6, %c0_7] : memref<32x2xi32, #tpu.memory_space<vmem>>, vector<32x1xi32>
    %18 = vector.broadcast %17 : vector<32x1xi32> to vector<32x32xi32>
    %19 = arith.cmpi eq, %16, %18 : vector<32x32xi32>
    %20 = arith.extui %19 : vector<32x32xi1> to vector<32x32xi32>
    %21 = arith.sitofp %20 : vector<32x32xi32> to vector<32x32xf32>
    %22 = arith.index_cast %3 : i32 to index
    %c0_8 = arith.constant 0 : index
    %c0_9 = arith.constant 0 : index
    %23 = vector.load %arg6[%22, %c0_8, %c0_9] : memref<50x32x32xf32, #tpu.memory_space<vmem>>, vector<1x32x32xf32>
    %24 = vector.shape_cast %23 : vector<1x32x32xf32> to vector<32x32xf32>
    %c1_i32 = arith.constant 1 : i32
    %25 = arith.subi %3, %c1_i32 : i32
    %c0_i32 = arith.constant 0 : i32
    %26 = arith.maxsi %25, %c0_i32 : i32
    %27 = arith.index_cast %26 : i32 to index
    %c0_10 = arith.constant 0 : index
    %c0_11 = arith.constant 0 : index
    %28 = vector.load %arg6[%27, %c0_10, %c0_11] : memref<50x32x32xf32, #tpu.memory_space<vmem>>, vector<1x32x32xf32>
    %29 = vector.shape_cast %28 : vector<1x32x32xf32> to vector<32x32xf32>
    %30 = arith.index_cast %3 : i32 to index
    %c0_12 = arith.constant 0 : index
    %c0_13 = arith.constant 0 : index
    %31 = vector.load %arg7[%30, %c0_12, %c0_13] : memref<50x32x32xf32, #tpu.memory_space<vmem>>, vector<1x32x32xf32>
    %32 = vector.shape_cast %31 : vector<1x32x32xf32> to vector<32x32xf32>
    %cst_14 = arith.constant dense<0.000000e+00> : vector<32x32xf32>
    %33 = tpu.matmul %21, %24, %cst_14 {dimension_numbers = #tpu.dot_dimension_numbers<[1], [0], [0], [1], [0, 0, 1, 1], [], []>} : vector<32x32xf32>, vector<32x32xf32>, vector<32x32xf32> -> vector<32x32xf32>
    %cst_15 = arith.constant dense<0.000000e+00> : vector<32x32xf32>
    %34 = tpu.matmul %21, %29, %cst_15 {dimension_numbers = #tpu.dot_dimension_numbers<[1], [0], [0], [1], [0, 0, 1, 1], [], []>} : vector<32x32xf32>, vector<32x32xf32>, vector<32x32xf32> -> vector<32x32xf32>
    %cst_16 = arith.constant dense<0.000000e+00> : vector<32x32xf32>
    %35 = tpu.matmul %34, %32, %cst_16 {dimension_numbers = #tpu.dot_dimension_numbers<[1], [0], [0], [1], [0, 0, 1, 1], [], []>} : vector<32x32xf32>, vector<32x32xf32>, vector<32x32xf32> -> vector<32x32xf32>
    %cst_17 = arith.constant dense<0.000000e+00> : vector<32xf32>
    %36 = vector.multi_reduction <add>, %35, %cst_17 [1] : vector<32x32xf32> to vector<32xf32>
    %37 = vector.shape_cast %36 : vector<32xf32> to vector<32x1xf32>
    %cst_18 = arith.constant 1.000000e-10 : f32
    %38 = vector.broadcast %cst_18 : f32 to vector<32x1xf32>
    %39 = arith.addf %37, %38 : vector<32x1xf32>
    %40 = tpu.reciprocal %39 {approx = true} : vector<32x1xf32> -> vector<32x1xf32>
    %41 = vector.broadcast %40 : vector<32x1xf32> to vector<32x32xf32>
    %42 = arith.mulf %35, %41 : vector<32x32xf32>
    %43 = vector.shape_cast %15 : vector<32x1xf32> to vector<32x1xf32>
    %44 = vector.broadcast %43 : vector<32x1xf32> to vector<32x32xf32>
    %45 = tpu.concatenate %33, %44 in 1 : vector<32x32xf32>, vector<32x32xf32> -> vector<32x64xf32>
    %46 = arith.index_cast %3 : i32 to index
    %c0_19 = arith.constant 0 : index
    %c0_20 = arith.constant 0 : index
    %47 = vector.load %arg9[%46, %c0_19, %c0_20] : memref<50x1x128xf32, #tpu.memory_space<vmem>>, vector<1x1x128xf32>
    %48 = vector.shape_cast %47 : vector<1x1x128xf32> to vector<1x128xf32>
    %49 = vector.shape_cast %48 : vector<1x128xf32> to vector<1x128xf32>
    %50 = vector.broadcast %49 : vector<1x128xf32> to vector<32x128xf32>
    %c1 = arith.constant 1 : index
    %51 = memref.load %arg1[%c1] : memref<2xi32, #tpu.memory_space<smem>>
    %52 = arith.index_cast %51 : i32 to index
    %53 = memref.load %arg8[%52] : memref<100xf32, #tpu.memory_space<smem>>
    %c50_i32_21 = arith.constant 50 : i32
    %54 = arith.addi %c50_i32_21, %51 : i32
    %55 = arith.index_cast %54 : i32 to index
    %56 = memref.load %arg8[%55] : memref<100xf32, #tpu.memory_space<smem>>
    %c0_22 = arith.constant 0 : index
    %c1_23 = arith.constant 1 : index
    %57 = vector.load %arg3[%c0_22, %c1_23] : memref<32x2xf32, #tpu.memory_space<vmem>>, vector<32x1xf32>
    %58 = vector.extract_strided_slice %2 {offsets = [0, 1], sizes = [32, 1], strides = [1, 1]} : vector<32x2xf32> to vector<32x1xf32>
    %59 = vector.broadcast %53 : f32 to vector<32x1xf32>
    %60 = arith.mulf %59, %58 : vector<32x1xf32>
    %61 = vector.broadcast %56 : f32 to vector<32x1xf32>
    %62 = arith.mulf %61, %57 : vector<32x1xf32>
    %63 = arith.addf %60, %62 : vector<32x1xf32>
    %64 = tpu.iota {dimensions = array<i32: 1>} : vector<32x32xi32>
    %c0_24 = arith.constant 0 : index
    %c1_25 = arith.constant 1 : index
    %65 = vector.load %arg4[%c0_24, %c1_25] : memref<32x2xi32, #tpu.memory_space<vmem>>, vector<32x1xi32>
    %66 = vector.broadcast %65 : vector<32x1xi32> to vector<32x32xi32>
    %67 = arith.cmpi eq, %64, %66 : vector<32x32xi32>
    %68 = arith.extui %67 : vector<32x32xi1> to vector<32x32xi32>
    %69 = arith.sitofp %68 : vector<32x32xi32> to vector<32x32xf32>
    %70 = arith.index_cast %51 : i32 to index
    %c0_26 = arith.constant 0 : index
    %c0_27 = arith.constant 0 : index
    %71 = vector.load %arg6[%70, %c0_26, %c0_27] : memref<50x32x32xf32, #tpu.memory_space<vmem>>, vector<1x32x32xf32>
    %72 = vector.shape_cast %71 : vector<1x32x32xf32> to vector<32x32xf32>
    %c1_i32_28 = arith.constant 1 : i32
    %73 = arith.subi %51, %c1_i32_28 : i32
    %c0_i32_29 = arith.constant 0 : i32
    %74 = arith.maxsi %73, %c0_i32_29 : i32
    %75 = arith.index_cast %74 : i32 to index
    %c0_30 = arith.constant 0 : index
    %c0_31 = arith.constant 0 : index
    %76 = vector.load %arg6[%75, %c0_30, %c0_31] : memref<50x32x32xf32, #tpu.memory_space<vmem>>, vector<1x32x32xf32>
    %77 = vector.shape_cast %76 : vector<1x32x32xf32> to vector<32x32xf32>
    %78 = arith.index_cast %51 : i32 to index
    %c0_32 = arith.constant 0 : index
    %c0_33 = arith.constant 0 : index
    %79 = vector.load %arg7[%78, %c0_32, %c0_33] : memref<50x32x32xf32, #tpu.memory_space<vmem>>, vector<1x32x32xf32>
    %80 = vector.shape_cast %79 : vector<1x32x32xf32> to vector<32x32xf32>
    %cst_34 = arith.constant dense<0.000000e+00> : vector<32x32xf32>
    %81 = tpu.matmul %69, %72, %cst_34 {dimension_numbers = #tpu.dot_dimension_numbers<[1], [0], [0], [1], [0, 0, 1, 1], [], []>} : vector<32x32xf32>, vector<32x32xf32>, vector<32x32xf32> -> vector<32x32xf32>
    %cst_35 = arith.constant dense<0.000000e+00> : vector<32x32xf32>
    %82 = tpu.matmul %69, %77, %cst_35 {dimension_numbers = #tpu.dot_dimension_numbers<[1], [0], [0], [1], [0, 0, 1, 1], [], []>} : vector<32x32xf32>, vector<32x32xf32>, vector<32x32xf32> -> vector<32x32xf32>
    %cst_36 = arith.constant dense<0.000000e+00> : vector<32x32xf32>
    %83 = tpu.matmul %82, %80, %cst_36 {dimension_numbers = #tpu.dot_dimension_numbers<[1], [0], [0], [1], [0, 0, 1, 1], [], []>} : vector<32x32xf32>, vector<32x32xf32>, vector<32x32xf32> -> vector<32x32xf32>
    %cst_37 = arith.constant dense<0.000000e+00> : vector<32xf32>
    %84 = vector.multi_reduction <add>, %83, %cst_37 [1] : vector<32x32xf32> to vector<32xf32>
    %85 = vector.shape_cast %84 : vector<32xf32> to vector<32x1xf32>
    %cst_38 = arith.constant 1.000000e-10 : f32
    %86 = vector.broadcast %cst_38 : f32 to vector<32x1xf32>
    %87 = arith.addf %85, %86 : vector<32x1xf32>
    %88 = tpu.reciprocal %87 {approx = true} : vector<32x1xf32> -> vector<32x1xf32>
    %89 = vector.broadcast %88 : vector<32x1xf32> to vector<32x32xf32>
    %90 = arith.mulf %83, %89 : vector<32x32xf32>
    %91 = vector.shape_cast %63 : vector<32x1xf32> to vector<32x1xf32>
    %92 = vector.broadcast %91 : vector<32x1xf32> to vector<32x32xf32>
    %93 = tpu.concatenate %81, %92 in 1 : vector<32x32xf32>, vector<32x32xf32> -> vector<32x64xf32>
    %94 = arith.index_cast %51 : i32 to index
    %c0_39 = arith.constant 0 : index
    %c0_40 = arith.constant 0 : index
    %95 = vector.load %arg9[%94, %c0_39, %c0_40] : memref<50x1x128xf32, #tpu.memory_space<vmem>>, vector<1x1x128xf32>
    %96 = vector.shape_cast %95 : vector<1x1x128xf32> to vector<1x128xf32>
    %97 = vector.shape_cast %96 : vector<1x128xf32> to vector<1x128xf32>
    %98 = vector.broadcast %97 : vector<1x128xf32> to vector<32x128xf32>
    %99 = tpu.concatenate %45, %93 in 0 : vector<32x64xf32>, vector<32x64xf32> -> vector<64x64xf32>
    %100 = tpu.concatenate %50, %98 in 0 : vector<32x128xf32>, vector<32x128xf32> -> vector<64x128xf32>
    %101 = tpu.concatenate %42, %90 in 0 : vector<32x32xf32>, vector<32x32xf32> -> vector<64x32xf32>
    %102 = tpu.concatenate %9, %57 in 0 : vector<32x1xf32>, vector<32x1xf32> -> vector<64x1xf32>
    %103 = arith.truncf %99 : vector<64x64xf32> to vector<64x64xbf16>
    %c0_41 = arith.constant 0 : index
    %c0_42 = arith.constant 0 : index
    %104 = vector.load %arg10[%c0_41, %c0_42] : memref<64x128xbf16, #tpu.memory_space<vmem>>, vector<64x128xbf16>
    %cst_43 = arith.constant dense<0.000000e+00> : vector<64x128xf32>
    %105 = tpu.matmul %103, %104, %cst_43 {dimension_numbers = #tpu.dot_dimension_numbers<[1], [0], [0], [1], [0, 0, 1, 1], [], []>} : vector<64x64xbf16>, vector<64x128xbf16>, vector<64x128xf32> -> vector<64x128xf32>
    %106 = arith.addf %105, %100 : vector<64x128xf32>
    %107 = arith.mulf %106, %106 : vector<64x128xf32>
    %108 = arith.mulf %106, %107 : vector<64x128xf32>
    %cst_44 = arith.constant 4.471500e-02 : f32
    %109 = vector.broadcast %cst_44 : f32 to vector<64x128xf32>
    %110 = arith.mulf %109, %108 : vector<64x128xf32>
    %111 = arith.addf %106, %110 : vector<64x128xf32>
    %cst_45 = arith.constant 0.797884583 : f32
    %112 = vector.broadcast %cst_45 : f32 to vector<64x128xf32>
    %113 = arith.mulf %112, %111 : vector<64x128xf32>
    %114 = math.tanh %113 : vector<64x128xf32>
    %cst_46 = arith.constant 1.000000e+00 : f32
    %115 = vector.broadcast %cst_46 : f32 to vector<64x128xf32>
    %116 = arith.addf %115, %114 : vector<64x128xf32>
    %cst_47 = arith.constant 5.000000e-01 : f32
    %117 = vector.broadcast %cst_47 : f32 to vector<64x128xf32>
    %118 = arith.mulf %117, %116 : vector<64x128xf32>
    %119 = arith.mulf %106, %118 : vector<64x128xf32>
    %120 = arith.truncf %119 : vector<64x128xf32> to vector<64x128xbf16>
    %c0_48 = arith.constant 0 : index
    %c0_49 = arith.constant 0 : index
    %121 = vector.load %arg11[%c0_48, %c0_49] : memref<128x128xbf16, #tpu.memory_space<vmem>>, vector<128x128xbf16>
    %cst_50 = arith.constant dense<0.000000e+00> : vector<64x128xf32>
    %122 = tpu.matmul %120, %121, %cst_50 {dimension_numbers = #tpu.dot_dimension_numbers<[1], [0], [0], [1], [0, 0, 1, 1], [], []>} : vector<64x128xbf16>, vector<128x128xbf16>, vector<64x128xf32> -> vector<64x128xf32>
    %123 = vector.extract_strided_slice %122 {offsets = [0, 0], sizes = [64, 32], strides = [1, 1]} : vector<64x128xf32> to vector<64x32xf32>
    %124 = vector.extract_strided_slice %122 {offsets = [0, 32], sizes = [64, 1], strides = [1, 1]} : vector<64x128xf32> to vector<64x1xf32>
    %125 = arith.subf %102, %124 : vector<64x1xf32>
    %126 = arith.mulf %125, %125 : vector<64x1xf32>
    %127 = vector.shape_cast %126 : vector<64x1xf32> to vector<1x64x1xf32>
    %cst_51 = arith.constant dense<0.000000e+00> : vector<1xf32>
    %128 = vector.multi_reduction <add>, %127, %cst_51 [1, 2] : vector<1x64x1xf32> to vector<1xf32>
    %129 = vector.shape_cast %128 : vector<1xf32> to vector<1x1x1xf32>
    %130 = vector.extract %129[0, 0, 0] : f32 from vector<1x1x1xf32>
    %cst_52 = arith.constant 1.562500e-02 : f32
    %131 = arith.mulf %130, %cst_52 : f32
    %cst_53 = arith.constant dense<0xFF800000> : vector<64xf32>
    %132 = vector.multi_reduction <maximumf>, %123, %cst_53 [1] : vector<64x32xf32> to vector<64xf32>
    %133 = vector.shape_cast %132 : vector<64xf32> to vector<64x1xf32>
    %134 = vector.broadcast %133 : vector<64x1xf32> to vector<64x32xf32>
    %135 = arith.subf %123, %134 : vector<64x32xf32>
    %136 = math.exp %135 : vector<64x32xf32>
    %137 = arith.mulf %101, %136 : vector<64x32xf32>
    %cst_54 = arith.constant dense<0.000000e+00> : vector<64xf32>
    %138 = vector.multi_reduction <add>, %137, %cst_54 [1] : vector<64x32xf32> to vector<64xf32>
    %139 = vector.shape_cast %138 : vector<64xf32> to vector<64x1xf32>
    %140 = vector.broadcast %133 : vector<64x1xf32> to vector<64x32xf32>
    %141 = arith.subf %123, %140 : vector<64x32xf32>
    %142 = arith.mulf %101, %141 : vector<64x32xf32>
    %cst_55 = arith.constant dense<0.000000e+00> : vector<64xf32>
    %143 = vector.multi_reduction <add>, %142, %cst_55 [1] : vector<64x32xf32> to vector<64xf32>
    %144 = vector.shape_cast %143 : vector<64xf32> to vector<64x1xf32>
    %cst_56 = arith.constant 1.000000e-10 : f32
    %145 = vector.broadcast %cst_56 : f32 to vector<64x1xf32>
    %146 = arith.addf %139, %145 : vector<64x1xf32>
    %147 = math.log %146 : vector<64x1xf32>
    %148 = arith.subf %147, %144 : vector<64x1xf32>
    %149 = vector.shape_cast %148 : vector<64x1xf32> to vector<1x64x1xf32>
    %cst_57 = arith.constant dense<0.000000e+00> : vector<1xf32>
    %150 = vector.multi_reduction <add>, %149, %cst_57 [1, 2] : vector<1x64x1xf32> to vector<1xf32>
    %151 = vector.shape_cast %150 : vector<1xf32> to vector<1x1x1xf32>
    %152 = vector.extract %151[0, 0, 0] : f32 from vector<1x1x1xf32>
    %cst_58 = arith.constant 1.562500e-02 : f32
    %153 = arith.mulf %152, %cst_58 : f32
    %cst_59 = arith.constant 5.000000e+01 : f32
    %154 = arith.mulf %cst_59, %153 : f32
    %cst_60 = arith.constant 1.000000e+00 : f32
    %155 = arith.mulf %cst_60, %131 : f32
    %156 = arith.addf %155, %154 : f32
    %157 = tpu.iota {dimensions = array<i32: 1>} : vector<1x128xi32>
    %c0_i32_61 = arith.constant 0 : i32
    %158 = vector.broadcast %c0_i32_61 : i32 to vector<1x128xi32>
    %159 = arith.cmpi eq, %157, %158 : vector<1x128xi32>
    %c1_i32_62 = arith.constant 1 : i32
    %160 = vector.broadcast %c1_i32_62 : i32 to vector<1x128xi32>
    %161 = arith.cmpi eq, %157, %160 : vector<1x128xi32>
    %c2_i32 = arith.constant 2 : i32
    %162 = vector.broadcast %c2_i32 : i32 to vector<1x128xi32>
    %163 = arith.cmpi eq, %157, %162 : vector<1x128xi32>
    %cst_63 = arith.constant 0.000000e+00 : f32
    %164 = vector.broadcast %154 : f32 to vector<1x128xf32>
    %165 = vector.broadcast %cst_63 : f32 to vector<1x128xf32>
    %166 = arith.select %163, %164, %165 : vector<1x128xi1>, vector<1x128xf32>
    %167 = vector.broadcast %131 : f32 to vector<1x128xf32>
    %168 = arith.select %161, %167, %166 : vector<1x128xi1>, vector<1x128xf32>
    %169 = vector.broadcast %156 : f32 to vector<1x128xf32>
    %170 = arith.select %159, %169, %168 : vector<1x128xi1>, vector<1x128xf32>
    %c0_64 = arith.constant 0 : index
    %c0_65 = arith.constant 0 : index
    %171 = vector.load %arg12[%c0_64, %c0_65] : memref<1x128xf32, #tpu.memory_space<vmem>>, vector<1x128xf32>
    tpu.vector_store %arg12[%c0_64, %c0_65], %170 {strides = array<i32>} : memref<1x128xf32, #tpu.memory_space<vmem>>, vector<1x128xf32>,
    return
  }
  func.func @transform_0(%arg0: i32, %arg1: memref<2xi32, #tpu.memory_space<smem>>) -> (i32, i32) {
    %c0_i32 = arith.constant 0 : i32
    %c0_i32_0 = arith.constant 0 : i32
    %c0_i32_1 = arith.constant 0 : i32
    return %c0_i32, %c0_i32_0 : i32, i32
  }
  func.func @transform_1(%arg0: i32, %arg1: memref<2xi32, #tpu.memory_space<smem>>) -> (i32, i32) {
    %c0_i32 = arith.constant 0 : i32
    %c0_i32_0 = arith.constant 0 : i32
    %c0_i32_1 = arith.constant 0 : i32
    return %c0_i32, %c0_i32_0 : i32, i32
  }
  func.func @transform_2(%arg0: i32, %arg1: memref<2xi32, #tpu.memory_space<smem>>) -> (i32, i32) {
    %c0_i32 = arith.constant 0 : i32
    %c0_i32_0 = arith.constant 0 : i32
    %c0_i32_1 = arith.constant 0 : i32
    return %c0_i32, %c0_i32_0 : i32, i32
  }
  func.func @transform_3(%arg0: i32, %arg1: memref<2xi32, #tpu.memory_space<smem>>) -> (i32, i32) {
    %c0_i32 = arith.constant 0 : i32
    %c0_i32_0 = arith.constant 0 : i32
    %c0_i32_1 = arith.constant 0 : i32
    return %c0_i32, %c0_i32_0 : i32, i32
  }
  func.func @transform_4(%arg0: i32, %arg1: memref<2xi32, #tpu.memory_space<smem>>) -> (i32, i32, i32) {
    %c0_i32 = arith.constant 0 : i32
    %c0_i32_0 = arith.constant 0 : i32
    %c0_i32_1 = arith.constant 0 : i32
    %c0_i32_2 = arith.constant 0 : i32
    return %c0_i32, %c0_i32_0, %c0_i32_1 : i32, i32, i32
  }
  func.func @transform_5(%arg0: i32, %arg1: memref<2xi32, #tpu.memory_space<smem>>) -> (i32, i32, i32) {
    %c0_i32 = arith.constant 0 : i32
    %c0_i32_0 = arith.constant 0 : i32
    %c0_i32_1 = arith.constant 0 : i32
    %c0_i32_2 = arith.constant 0 : i32
    return %c0_i32, %c0_i32_0, %c0_i32_1 : i32, i32, i32
  }
  func.func @transform_6(%arg0: i32, %arg1: memref<2xi32, #tpu.memory_space<smem>>) -> i32 {
    %c0_i32 = arith.constant 0 : i32
    %c0_i32_0 = arith.constant 0 : i32
    return %c0_i32 : i32
  }
  func.func @transform_7(%arg0: i32, %arg1: memref<2xi32, #tpu.memory_space<smem>>) -> (i32, i32, i32) {
    %c0_i32 = arith.constant 0 : i32
    %c0_i32_0 = arith.constant 0 : i32
    %c0_i32_1 = arith.constant 0 : i32
    %c0_i32_2 = arith.constant 0 : i32
    return %c0_i32, %c0_i32_0, %c0_i32_1 : i32, i32, i32
  }
  func.func @transform_8(%arg0: i32, %arg1: memref<2xi32, #tpu.memory_space<smem>>) -> (i32, i32) {
    %c0_i32 = arith.constant 0 : i32
    %c0_i32_0 = arith.constant 0 : i32
    %c0_i32_1 = arith.constant 0 : i32
    return %c0_i32, %c0_i32_0 : i32, i32
  }
  func.func @transform_9(%arg0: i32, %arg1: memref<2xi32, #tpu.memory_space<smem>>) -> (i32, i32) {
    %c0_i32 = arith.constant 0 : i32
    %c0_i32_0 = arith.constant 0 : i32
    %c0_i32_1 = arith.constant 0 : i32
    return %c0_i32, %c0_i32_0 : i32, i32
  }
  func.func @transform_10(%arg0: i32, %arg1: memref<2xi32, #tpu.memory_space<smem>>) -> (i32, i32) {
    %c0_i32 = arith.constant 0 : i32
    %c0_i32_0 = arith.constant 0 : i32
    %c0_i32_1 = arith.constant 0 : i32
    return %c0_i32, %c0_i32_0 : i32, i32
  }
}

</mosaic_0001>

<bundles_post_ra>
// kernel: calc_loss.1
= control target key start
LH: loop header
LB: loop body
LE: loop exit
PB: predicated region body
PF: predicated region fallthrough
CT: control target
= control target key end

     0   :  { %s2595_s0 = inlined_call_operand.vmem [shape: s32[2], index: 0, kind: input, shape index: {}]   ;;  %s2596_s1 = inlined_call_operand.vmem [shape: f32[32,2], index: 1, kind: input, shape index: {}]   ;;  %s2597_s2 = inlined_call_operand.vmem [shape: f32[32,2], index: 2, kind: input, shape index: {}]   ;;  %s2598_s3 = inlined_call_operand.vmem [shape: s32[32,2], index: 3, kind: input, shape index: {}]   ;;  %s2599_s4 = inlined_call_operand.vmem [shape: f32[32,32], index: 4, kind: input, shape index: {}]   ;;  %s2600_s5 = inlined_call_operand.vmem [shape: f32[50,32,32], index: 5, kind: input, shape index: {}]   ;;  %s2601_s6 = inlined_call_operand.vmem [shape: f32[50,32,32], index: 6, kind: input, shape index: {}]   ;;  %s2602_s7 = inlined_call_operand.vmem [shape: f32[100], index: 7, kind: input, shape index: {}]   ;;  %s2603_s8 = inlined_call_operand.vmem [shape: f32[50,1,128], index: 8, kind: input, shape index: {}]   ;;  %s2604_s9 = inlined_call_operand.vmem [shape: bf16[64,128], index: 9, kind: input, shape index: {}]   ;;  %s2605_s10 = inlined_call_operand.vmem [shape: bf16[128,128], index: 10, kind: input, shape index: {}]   ;;  %s2606_s11 = inlined_call_operand.vmem [shape: f32[1,128], index: 11, kind: output, shape index: {}]  }
   0x1   :  { %s16_s19 = sshll.u32 %s2595_s0, 4  ;;  %s17_s19 = int_to_ptr.vmem [resolvable:$true] %s16_s19 }
   0x2   :  { %s2021_s20 = scalar_lea.vmem %s17_s19, 16  ;;  %p2026_p1 = scmp.lt.s32.totalorder %s17_s19, %s17_s19 }
   0x3   :  { %p2022_p0 = scmp.ne.s32.totalorder %s17_s19, %s2021_s20  ;;  %p2027_p2 = scmp.lt.s32.totalorder %s2021_s20, %s2021_s20 }
   0x5   :  { %p2028_p3 = por %p2027_p2, %p2026_p1 }
   0x7   :  { %p2029_p4 = pnand %p2028_p3, %p2022_p0 }
   0x9   :  { %2032 = shalt.err (!%p2029_p4)  }
   0xa   :  { %s2049_s21 = smov [#allocation3]  }
   0xb   :  { %19 = dma.vmem_to_smem %s17_s19, 16, %s2049_s21, [#allocation2] }
   0xc   :  { %2045 = dma.done.wait [#allocation2], 16 }
   0xd   :  { %2046 = vsyncadd [#allocation2], 4294967280 }
   0xe   :  { %21 = sfence }
   0xf   :  { %22 = vsyncpa [#allocation5], 0  ;;  %s41_s24 = sshll.u32 %s2602_s7, 4  ;;  %s42_s24 = int_to_ptr.vmem [resolvable:$true] %s41_s24 }
  0x10   :  { %s2033_s0 = scalar_lea.vmem %s42_s24, 16  ;;  %p2038_p6 = scmp.lt.s32.totalorder %s42_s24, %s42_s24 }
  0x11   :  { %p2034_p5 = scmp.ne.s32.totalorder %s42_s24, %s2033_s0  ;;  %p2039_p7 = scmp.lt.s32.totalorder %s2033_s0, %s2033_s0 }
  0x13   :  { %p2040_p8 = por %p2039_p7, %p2038_p6 }
  0x15   :  { %p2041_p9 = pnand %p2040_p8, %p2034_p5 }
  0x17   :  { %2044 = shalt.err (!%p2041_p9)
}
  0x18   :  { %s2050_s25 = smov [#allocation4]  }
  0x19   :  { %44 = dma.vmem_to_smem %s42_s24, 16, %s2050_s25, [#allocation5]  }
  0x1a   :  { %2047 = dma.done.wait [#allocation5], 16  }
  0x1b   :  { %2048 = vsyncadd [#allocation5], 4294967280 }
  0x1c   :  { %54 = sfence }
  0x1d   :  { %v188_v0 = vld [vmem:[%s2598_s3 + $0x10] sm:$0xff]  ;;  %v186_v1 = vld [vmem:[%s2598_s3] sm:$0xff]  ;;  %vm64_vm0 = vcmask 261120   ;;  %v2051_v3 = vmov 0   ;;  %v61_v4 = vld [vmem:[%s2596_s1 + $0x8] sm:$0xff]  ;;  %s2136_s14 = sld [smem:[#allocation3]]  ;;  %v184_v34 = vlaneseq }
  0x1e   :  { %v60_v2 = vld [vmem:[%s2596_s1] sm:$0xff]  ;;  %1918 = vset.pattern.permute.xlu1 %v2051_v3  ;;  %1917 = vset.pattern.permute.xlu0 %v2051_v3  ;;  %v62_v6 = vld [vmem:[%s2596_s1 + $0x10] sm:$0xff]  ;;  %v63_v7 = vld [vmem:[%s2596_s1 + $0x18] sm:$0xff]  ;;  %s2154_s1 = sld [smem:[#allocation3 + $0x1]]  ;;  %v2052_v17 = vmov 1   ;;  %v2053_v38 = vmov 0.0  }
  0x1f   :  { %197 = vperm.xlu1 %1918, %v188_v0   ;;  %191 = vperm.xlu0 %1917, %v186_v1   ;;  %v1850_v5 = vpack.c.bf16 %v61_v4, %v60_v2  ;;  %v56_v8 = vld [vmem:[%s2599_s4] sm:$0xff]  ;;  %v189_v9 = vld [vmem:[%s2598_s3 + $0x18] sm:$0xff]  ;;  %v187_v10 = vld [vmem:[%s2598_s3 + $0x8] sm:$0xff]  ;;  %v1854_v11 = vpack.c.bf16 %v63_v7, %v62_v6  ;;  %v2197_v35 = vand.u32 127, %v184_v34  ;;  %vm1018_vm9 = vcmask 523264  }
  0x20   :  { %1720 = vmatprep.mubr.msk.f32.mxu1 %vm64_vm0, %v56_v8  ;;  %v57_v12 = vld [vmem:[%s2599_s4 + $0x8] sm:$0xff]  ;;  %v58_v13 = vld [vmem:[%s2599_s4 + $0x10] sm:$0xff]  ;;  %v59_v20 = vld [vmem:[%s2599_s4 + $0x18] sm:$0xff]  ;;  %vm1349_vm10 = vcmask 7168  }
  0x21   :  { %1851 = vmatprep.subr.bf16.mxu1 %v1850_v5  ;;  %v2241_v59 = vld [vmem:[%s2597_s2 + $0x8] sm:$0xff]  ;;  %vm1548_vm11 = vcmp.eq.s32.totalorder %v2197_v35, 2  ;;  %vm1547_vm12 = vcmp.eq.s32.totalorder %v2197_v35, 1  ;;  %vm1546_vm13 = vcmp.eq.s32.totalorder %v2197_v35, 0 }
  0x22   :  { %1853 = vmatpush3.bf16.msra.mxu1 %v1850_v5 }
  0x23   :  { %200 = vperm.xlu1 %1918, %v189_v9   ;;  %194 = vperm.xlu0 %1917, %v187_v10   ;;  %s1583_s26 = sshll.u32 %s2136_s14, 5  ;;  %s1584_s27 = sadd.s32 4294967295, %s2136_s14 }
  0x24   :  { %1855 = vmatprep.subr.bf16.mxu1 %v1854_v11  ;;  %s215_s30 = scalar_lea.vmem %s2600_s5, %s1583_s26  ;;  %p221_p10 = scmp.gt.s32.totalorder %s1584_s27, 0 }
  0x25   :  { %v216_v14 = vld [vmem:[%s215_s30] sm:$0xff]  ;;  %v217_v15 = vld [vmem:[%s215_s30 + $0x8] sm:$0xff]  ;;  %v218_v16 = vld [vmem:[%s215_s30 + $0x10] sm:$0xff]  ;;  %s1604_s16 = sshll.u32 %s2154_s1, 5  ;;  %s229_s24 = scalar_lea.vmem %s2601_s6, %s1583_s26 }
  0x26   :  { %1857 = vmatpush3.bf16.msra.mxu1 %v1854_v11  ;;  %v1858_v18 = vpack.c.bf16 %v217_v15, %v216_v14  ;;  %s2608_s27 = smov (!%p221_p10, %s1584_s27), 0  ;;  %v219_v19 = vld [vmem:[%s215_s30 + $0x18] sm:$0xff]  ;;  %s2185_s4 = scalar_lea.vmem %s2600_s5, %s1604_s16  ;;  %v230_v31 = vld [vmem:[%s229_s24] sm:$0xff]  ;;  %v231_v32 = vld [vmem:[%s229_s24 + $0x8] sm:$0xff] }
  0x27   :  { %1920 = vset.pattern.permute.xlu1 %v2052_v17  ;;  %1919 = vset.pattern.permute.xlu0 %v2052_v17  ;;  %v1862_v21 = vpack.c.bf16 %v219_v19, %v218_v16  ;;  %s1585_s15 = sshll.u32 %s2608_s27, 5  ;;  %v613_v28 = vld [vmem:[%s2185_s4] sm:$0xff]  ;;  %v614_v29 = vld [vmem:[%s2185_s4 + $0x8] sm:$0xff]  ;;  %v1874_v33 = vpack.c.bf16 %v231_v32, %v230_v31  ;;  %v615_v40 = vld [vmem:[%s2185_s4 + $0x10] sm:$0xff]  ;;  %s164_s0 = sadd.s32 50, %s2136_s14 }
  0x28   :  { %591 = vperm.xlu1 %1920, %v187_v10   ;;  %588 = vperm.xlu0 %1919, %v186_v1   ;;  %s224_s19 = scalar_lea.vmem %s2600_s5, %s1585_s15  ;;  %v1882_v30 = vpack.c.bf16 %v614_v29, %v613_v28  ;;  %v616_v41 = vld [vmem:[%s2185_s4 + $0x18] sm:$0xff]  ;;  %v232_v42 = vld [vmem:[%s229_s24 + $0x10] sm:$0xff]  ;;  %s571_s25 = sadd.s32 50, %s2154_s1 }
  0x29   :  { %1721 = vmatmul.mubr.msk.f32.vlgmr.msra.gmra.mrb[0].mxu1 %vm64_vm0, %v57_v12  ;;  %1859 = vmatprep.subr.bf16.mxu1 %v1858_v18  ;;  %v225_v22 = vld [vmem:[%s224_s19] sm:$0xff]  ;;  %v226_v23 = vld [vmem:[%s224_s19 + $0x8] sm:$0xff]  ;;  %v227_v24 = vld [vmem:[%s224_s19 + $0x10] sm:$0xff]  ;;  %v1886_v48 = vpack.c.bf16 %v616_v41, %v615_v40  ;;  %s165_s26 = sld [smem:[#allocation4 + %s164_s0]]  ;;  %s1605_s29 = sadd.s32 4294967295, %s2154_s1 }
  0x2a   :  { %1723 = vmatprep.mubr.msk.f32.mxu1 %vm64_vm0, %v58_v13  ;;  %1861 = vmatpush3.bf16.msra.mxu1 %v1858_v18  ;;  %v1866_v25 = vpack.c.bf16 %v226_v23, %v225_v22  ;;  %v228_v26 = vld [vmem:[%s224_s19 + $0x18] sm:$0xff]  ;;  %s572_s27 = sld [smem:[#allocation4 + %s571_s25]]  ;;  %p618_p11 = scmp.gt.s32.totalorder %s1605_s29, 0  ;;  %v2267_v13 = vld [vmem:[%s2597_s2 + $0x10] sm:$0xff] }
  0x2b   :  { %1863 = vmatprep.subr.bf16.mxu1 %v1862_v21  ;;  %v1870_v27 = vpack.c.bf16 %v228_v26, %v227_v24  ;;  %v233_v43 = vld [vmem:[%s229_s24 + $0x18] sm:$0xff]  ;;  %s163_s28 = sld [smem:[#allocation4 + %s2136_s14]]  ;;  %s958_s24 = scalar_lea.vmem %s2603_s8, %s2154_s1 }
  0x2c   :  { %594 = vperm.xlu1 %1920, %v188_v0   ;;  %597 = vperm.xlu0 %1919, %v189_v9   ;;  %v1878_v49 = vpack.c.bf16 %v233_v43, %v232_v42  ;;  %s570_s3 = sld [smem:[#allocation4 + %s2154_s1]]  ;;  %s2610_s29 = smov (!%p618_p11, %s1605_s29), 0  ;;  %v2253_v0 = vld [vmem:[%s2597_s2] sm:$0xff]  ;;  %v2262_v9 = vld [vmem:[%s2597_s2 + $0x18] sm:$0xff] }
  0x2d   :  { %1724 = vmatmul.mubr.msk.f32.gmra.mrb[2].mxu1 %vm64_vm0, %v59_v20  ;;  %1867 = vmatprep.subr.bf16.mxu0 %v1866_v25  ;;  %s1606_s7 = sshll.u32 %s2610_s29, 5  ;;  %s2054_s2 = smov 127  }
  0x2e   :  { %1865 = vmatpush3.bf16.msra.mxu1 %v1862_v21  ;;  %1869 = vmatpush3.bf16.msra.mxu0 %v1866_v25  ;;  %s2246_s17 = scalar_lea.vmem %s2600_s5, %s1606_s7  ;;  %s561_s5 = scalar_lea.vmem %s2603_s8, %s2136_s14 }
  0x2f   :  { %1871 = vmatprep.subr.bf16.mxu0 %v1870_v27  ;;  %1875 = vmatprep.subr.bf16.mxu1 %v1874_v33  ;;  %v175_v60 = vstv %s165_s26  ;;  %v622_v62 = vld [vmem:[%s2246_s17] sm:$0xff]  ;;  %v623_v63 = vld [vmem:[%s2246_s17 + $0x8] sm:$0xff]  ;;  %v624_v40 = vld [vmem:[%s2246_s17 + $0x10] sm:$0xff] }
  0x30   :  { %1921 = vset.pattern.permute.xlu1 %v2051_v3  ;;  %1927 = vset.pattern.permute.xlu0 %v2051_v3  ;;  %v578_v61 = vstv %s572_s27  ;;  %v1890_v1 = vpack.c.bf16 %v623_v63, %v622_v62  ;;  %v177_v4 = vmul.f32 %v175_v60, %v2241_v59  ;;  %v176_v7 = vmul.f32 %v175_v60, %v2253_v0  ;;  %v625_v41 = vld [vmem:[%s2246_s17 + $0x18] sm:$0xff] }
  0x31   :  { %v170_v2 = vstv %s163_s28  ;;  %v580_v5 = vmul.f32 %v578_v61, %v2241_v59  ;;  %v579_v8 = vmul.f32 %v578_v61, %v2253_v0  ;;  %v179_v19 = vmul.f32 %v175_v60, %v2262_v9 }
  0x32   :  { %1873 = vmatpush3.bf16.msra.mxu0 %v1870_v27  ;;  %v573_v3 = vstv %s570_s3  ;;  %v582_v20 = vmul.f32 %v578_v61, %v2262_v9  ;;  %v178_v24 = vmul.f32 %v175_v60, %v2267_v13  ;;  %v581_v25 = vmul.f32 %v578_v61, %v2267_v13  ;;  %s626_s3 = scalar_lea.vmem %s2601_s6, %s1604_s16 }
  0x33   :  { %1883 = vmatprep.subr.bf16.mxu0 %v1882_v30 }
  0x9e   :  { %v198_v36 = vpop.permute.xlu1 %197  ;;  %v192_v37 = vpop.permute.xlu0 %191 }
  0x9f   :  { %vm202_vm1 = vcmp.eq.s32.totalorder %v2197_v35, %v192_v37  ;;  %vm204_vm2 = vcmp.eq.s32.totalorder %v2197_v35, %v198_v36 }
  0xa0   :  { %v1579_v39 = vsel %vm202_vm1, 1.0, %v2053_v38  ;;  %v1581_v46 = vsel %vm204_vm2, 1.0, %v2053_v38 }
  0xa1   :  { %1734 = vmatprep.mubr.msk.f32.mxu1 %vm64_vm0, %v1579_v39  ;;  %1748 = vmatprep.mubr.msk.f32.mxu0 %vm64_vm0, %v1579_v39 }
  0xa2   :  { %v201_v44 = vpop.permute.xlu1 %200  ;;  %v195_v45 = vpop.permute.xlu0 %194 }
  0xa3   :  { %vm203_vm3 = vcmp.eq.s32.totalorder %v2197_v35, %v195_v45  ;;  %vm205_vm4 = vcmp.eq.s32.totalorder %v2197_v35, %v201_v44 }
  0xa4   :  { %v1580_v47 = vsel %vm203_vm3, 1.0, %v2053_v38  ;;  %v1582_v52 = vsel %vm205_vm4, 1.0, %v2053_v38 }
  0xa5   :  { %1735 = vmatmul.mubr.msk.f32.vlgmr.msra.gmra.mrb[4].mxu1 %vm64_vm0, %v1580_v47  ;;  %1749 = vmatmul.mubr.msk.f32.vlgmr.msra.gmra.mrb[0].mxu0 %vm64_vm0, %v1580_v47 }
  0xa6   :  { %1737 = vmatprep.mubr.msk.f32.mxu1 %vm64_vm0, %v1581_v46  ;;  %1751 = vmatprep.mubr.msk.f32.mxu0 %vm64_vm0, %v1581_v46  ;;  %v1894_v46 = vpack.c.bf16 %v625_v41, %v624_v40  ;;  %v1950_v41 = vld [vmem:[%s2605_s10 + $0x8] sm:$0xff]  }
  0xa7   :  { %1885 = vmatpush3.bf16.msra.mxu0 %v1882_v30  ;;  %v592_v50 = vpop.permute.xlu1 %591  ;;  %v589_v51 = vpop.permute.xlu0 %588  ;;  %1877 = vmatpush3.bf16.msra.mxu1 %v1874_v33 }
  0xa8   :  { %vm600_vm5 = vcmp.eq.s32.totalorder %v2197_v35, %v592_v50  ;;  %vm599_vm6 = vcmp.eq.s32.totalorder %v2197_v35, %v589_v51  ;;  %1887 = vmatprep.subr.bf16.mxu0 %v1886_v48  ;;  %1879 = vmatprep.subr.bf16.mxu1 %v1878_v49  ;;  %v1945_v50 = vld [vmem:[%s2604_s9] sm:$0xff]   ;;  %v1946_v51 = vld [vmem:[%s2604_s9 + $0x8] sm:$0xff]  }
  0xa9   :  { %1738 = vmatmul.mubr.msk.f32.gmra.mrb[6].mxu1 %vm64_vm0, %v1582_v52  ;;  %1752 = vmatmul.mubr.msk.f32.gmra.mrb[2].mxu0 %vm64_vm0, %v1582_v52  ;;  %v2215_v53 = vsel %vm599_vm6, 1.0, %v2053_v38  ;;  %v2219_v54 = vsel %vm600_vm5, 1.0, %v2053_v38 }
  0xaa   :  { %1776 = vmatprep.mubr.msk.f32.mxu0 %vm64_vm0, %v2215_v53 }
  0xab   :  { %1889 = vmatpush3.bf16.msra.mxu0 %v1886_v48  ;;  %v595_v55 = vpop.permute.xlu1 %594  ;;  %v598_v56 = vpop.permute.xlu0 %597  ;;  %1881 = vmatpush3.bf16.msra.mxu1 %v1878_v49 }
  0xac   :  { %vm601_vm7 = vcmp.eq.s32.totalorder %v2197_v35, %v595_v55  ;;  %vm602_vm8 = vcmp.eq.s32.totalorder %v2197_v35, %v598_v56  ;;  %1891 = vmatprep.subr.bf16.mxu1 %v1890_v1 }
  0xad   :  { %v2223_v57 = vsel %vm601_vm7, 1.0, %v2053_v38  ;;  %v2227_v58 = vsel %vm602_vm8, 1.0, %v2053_v38 }
  0xae   :  { %1777 = vmatmul.mubr.msk.f32.vlgmr.msra.gmra.mrb[4].mxu0 %vm64_vm0, %v2219_v54 }
  0xaf   :  { %1779 = vmatprep.mubr.msk.f32.mxu0 %vm64_vm0, %v2223_v57 }
  0xb2   :  { %1780 = vmatmul.mubr.msk.f32.gmra.mrb[6].mxu0 %vm64_vm0, %v2227_v58 }
  0xfc   :  { %v1722_v6 = vpop.f32.mrb[0].mxu1 }
  0xfd   :  { %v172_v10 = vmul.f32 %v1722_v6, %v170_v2  ;;  %v575_v11 = vmul.f32 %v1722_v6, %v573_v3  ;;  %v143_v12 = vpop.f32.mrb[1].mxu1 }
  0xfe   :  { %v171_v14 = vmul.f32 %v170_v2, %v143_v12  ;;  %v574_v15 = vmul.f32 %v573_v3, %v143_v12 }
  0xff   :  { %v181_v16 = vadd.f32 %v177_v4, %v172_v10  ;;  %v584_v18 = vadd.f32 %v580_v5, %v575_v11 }
 0x100   :  { %v180_v21 = vadd.f32 %v176_v7, %v171_v14  ;;  %v583_v22 = vadd.f32 %v579_v8, %v574_v15  ;;  %v1725_v23 = vpop.f32.mrb[2].mxu1  ;;  %v1948_v8 = vld [vmem:[%s2604_s9 + $0x18] sm:$0xff]  }
 0x101   :  { %v174_v26 = vmul.f32 %v1725_v23, %v170_v2  ;;  %v577_v27 = vmul.f32 %v1725_v23, %v573_v3  ;;  %v153_v28 = vpop.f32.mrb[3].mxu1  ;;  %v627_v23 = vld [vmem:[%s626_s3] sm:$0xff] }
 0x102   :  { %v173_v29 = vmul.f32 %v170_v2, %v153_v28  ;;  %v576_v30 = vmul.f32 %v573_v3, %v153_v28  ;;  %v1922_v31 = vpack.i.bf16 %v181_v16, %v180_v21  ;;  %v1934_v32 = vpack.i.bf16 %v584_v18, %v583_v22 }
 0x103   :  { %v183_v33 = vadd.f32 %v179_v19, %v174_v26  ;;  %v586_v34 = vadd.f32 %v582_v20, %v577_v27  ;;  %v629_v26 = vld [vmem:[%s626_s3 + $0x10] sm:$0xff]  ;;  %v630_v27 = vld [vmem:[%s626_s3 + $0x18] sm:$0xff] }
 0x104   :  { %v182_v36 = vadd.f32 %v178_v24, %v173_v29  ;;  %v585_v37 = vadd.f32 %v581_v25, %v576_v30  ;;  %1923 = vperm.xlu1 %1921, %v1922_v31   ;;  %v628_v24 = vld [vmem:[%s626_s3 + $0x8] sm:$0xff]  ;;  %v1902_v28 = vpack.c.bf16 %v630_v27, %v629_v26  ;;  %v1949_v29 = vld [vmem:[%s2605_s10] sm:$0xff]  }
 0x105   :  { %v1898_v25 = vpack.c.bf16 %v628_v24, %v627_v23 }
 0x106   :  { %v1928_v38 = vpack.i.bf16 %v183_v33, %v182_v36  ;;  %v1939_v39 = vpack.i.bf16 %v586_v34, %v585_v37 }
 0x107   :  { %1899 = vmatprep.subr.bf16.mxu0 %v1898_v25 }
 0x108   :  { %1933 = vset.pattern.permute.xlu1 %v2052_v17  ;;  %1929 = vperm.xlu0 %1927, %v1928_v38  }
 0x109   :  { %1935 = vperm.xlu1 %1933, %v1934_v32   ;;  %1901 = vmatpush3.bf16.msra.mxu0 %v1898_v25 }
 0x10a   :  { %1903 = vmatprep.subr.bf16.mxu0 %v1902_v28 }
 0x10c   :  { %1944 = vset.pattern.permute.xlu0 %v2052_v17 }
 0x10d   :  { %1940 = vperm.xlu1 %1933, %v1939_v39   ;;  %970 = vrot.lane.b32.xlu0 %v2253_v0, %s2054_s2 }
 0x10e   :  { %1905 = vmatpush3.bf16.msra.mxu0 %v1902_v28 }
 0x10f   :  { %1826 = vmatprep.subr.bf16.mxu0 %v1949_v29 }
 0x178   :  { %v1736_v42 = vpop.f32.mrb[4].mxu1  ;;  %v1750_v43 = vpop.f32.mrb[0].mxu0 }
 0x179   :  { %v312_v44 = vpop.f32.mrb[5].mxu1  ;;  %v397_v45 = vpop.f32.mrb[1].mxu0 }
 0x17a   :  { %1762 = vmatprep.mubr.msk.f32.mxu1 %vm64_vm0, %v397_v45  ;;  %v1952_v45 = vld [vmem:[%s2605_s10 + $0x18] sm:$0xff]  }
 0x17b   :  { %1763 = vmatmul.mubr.msk.f32.vlgmr.msra.gmra.mrb[8].mxu1 %vm64_vm0, %v1750_v43 }
 0x17c   :  { %1893 = vmatpush3.bf16.msra.mxu1 %v1890_v1  ;;  %v1739_v47 = vpop.f32.mrb[6].mxu1  ;;  %v1753_v48 = vpop.f32.mrb[2].mxu0 }
 0x17d   :  { %v322_v17 = vpop.f32.mrb[7].mxu1  ;;  %v407_v49 = vpop.f32.mrb[3].mxu0  ;;  %1895 = vmatprep.subr.bf16.mxu1 %v1894_v46 }
 0x17e   :  { %1765 = vmatprep.mubr.msk.f32.mxu1 %vm64_vm0, %v407_v49 }
 0x17f   :  { %1766 = vmatmul.mubr.msk.f32.gmra.mrb[10].mxu1 %vm64_vm0, %v1753_v48 }
 0x180   :  { %1897 = vmatpush3.bf16.msra.mxu1 %v1894_v46  ;;  %1790 = vmatprep.mubr.msk.f32.mxu1 %vm64_vm0, %v2215_v53  ;;  %v1947_v53 = vld [vmem:[%s2604_s9 + $0x10] sm:$0xff]   ;;  %v1953_v46 = vld [vmem:[%s2605_s10 + $0x20] sm:$0xff]  }
 0x181   :  { %1810 = vmatprep.subr.bf16.mxu1 %v1945_v50  ;;  %v1778_v52 = vpop.f32.mrb[4].mxu0 }
 0x182   :  { %v709_v55 = vpop.f32.mrb[5].mxu0 }
 0x183   :  { %v1924_v56 = vpop.permute.xlu1 %1923  ;;  %1791 = vmatmul.mubr.msk.f32.vlgmr.msra.gmra.mrb[12].mxu1 %vm64_vm0, %v2219_v54 }
 0x184   :  { %v1926_v60 = vunpack.i.h.bf16 %v1924_v56  ;;  %v1925_v61 = vunpack.i.l.bf16 %v1924_v56  ;;  %1811 = vmatpush3.bf16.msra.mxu1 %v1945_v50  ;;  %1793 = vmatprep.mubr.msk.f32.mxu1 %vm64_vm0, %v2223_v57  ;;  %v1954_v50 = vld [vmem:[%s2605_s10 + $0x28] sm:$0xff]  }
 0x185   :  { %1812 = vmatprep.subr.bf16.mxu1 %v1946_v51  ;;  %v1781_v62 = vpop.f32.mrb[6].mxu0 }
 0x186   :  { %v557_v63 = vsel %vm64_vm0, %v312_v44, %v1925_v61  ;;  %v558_v1 = vsel %vm64_vm0, %v1736_v42, %v1926_v60  ;;  %v719_v2 = vpop.f32.mrb[7].mxu0  ;;  %v1951_v44 = vld [vmem:[%s2605_s10 + $0x10] sm:$0xff]  }
 0x187   :  { %v982_v3 = vpack.c.bf16 %v558_v1, %v557_v63  ;;  %v1930_v54 = vpop.permute.xlu0 %1929  ;;  %1794 = vmatmul.mubr.msk.f32.gmra.mrb[14].mxu1 %vm64_vm0, %v2227_v58  ;;  %v1955_v1 = vld [vmem:[%s2605_s10 + $0x30] sm:$0xff]  }
 0x188   :  { %v1932_v4 = vunpack.i.h.bf16 %v1930_v54  ;;  %v1931_v5 = vunpack.i.l.bf16 %v1930_v54  ;;  %1813 = vmatpush3.bf16.msra.mxu1 %v1946_v51  ;;  %v1936_v57 = vpop.permute.xlu1 %1935  ;;  %v1619_v54 = vld [vmem:[%s958_s24] ss:$0 sm:$0xff] }
 0x189   :  { %v1938_v6 = vunpack.i.h.bf16 %v1936_v57  ;;  %v1937_v7 = vunpack.i.l.bf16 %v1936_v57  ;;  %1818 = vmatprep.mubr.msk.bf16.mxu1 %vm1018_vm9, %v982_v3  ;;  %1814 = vmatprep.subr.bf16.mxu1 %v1947_v53 }
 0x18a   :  { %v560_v10 = vsel %vm64_vm0, %v1739_v47, %v1932_v4  ;;  %v559_v11 = vsel %vm64_vm0, %v322_v17, %v1931_v5  ;;  %v1598_v47 = vld [vmem:[%s561_s5] ss:$0 sm:$0xff] }
 0x18b   :  { %v983_v12 = vpack.c.bf16 %v560_v10, %v559_v11  ;;  %v955_v58 = vsel %vm64_vm0, %v1778_v52, %v1938_v6  ;;  %v954_v14 = vsel %vm64_vm0, %v709_v55, %v1937_v7 }
 0x18c   :  { %v984_v15 = vpack.c.bf16 %v955_v58, %v954_v14  ;;  %1815 = vmatpush3.bf16.msra.mxu1 %v1947_v53  ;;  %v1941_v16 = vpop.permute.xlu1 %1940  ;;  %v1956_v58 = vld [vmem:[%s2605_s10 + $0x38] sm:$0xff]   ;;  %s2055_s10 = smov 96  }
 0x18d   :  { %v1943_v18 = vunpack.i.h.bf16 %v1941_v16  ;;  %v1942_v19 = vunpack.i.l.bf16 %v1941_v16  ;;  %1816 = vmatprep.subr.bf16.mxu1 %v1948_v8 }
 0x18f   :  { %v957_v20 = vsel %vm64_vm0, %v1781_v62, %v1943_v18  ;;  %v956_v21 = vsel %vm64_vm0, %v719_v2, %v1942_v19 }
 0x190   :  { %v985_v22 = vpack.c.bf16 %v957_v20, %v956_v21  ;;  %1817 = vmatpush3.bf16.msra.mxu1 %v1948_v8 }
 0x193   :  { %1819 = vmatmul.mubr.msk.bf16.vlgmr.msra.gmra.mrb[16].mxu1 %vm1018_vm9, %v983_v12 }
 0x194   :  { %1822 = vmatprep.mubr.msk.bf16.mxu1 %vm1018_vm9, %v984_v15 }
 0x19b   :  { %1823 = vmatmul.mubr.msk.bf16.gmra.mrb[20].mxu1 %vm1018_vm9, %v985_v22 }
 0x24e   :  { %v2323_v30 = vpop.f32.mrb[8].mxu1 }
 0x24f   :  { %v2325_v31 = vpop.f32.mrb[9].mxu1  ;;  %v516_v32 = vsel %vm64_vm0, %v2323_v30, 0.0 }
 0x250   :  { %517 = vadd.xlane.f32.xlu1 %v516_v32  ;;  %v513_v33 = vsel %vm64_vm0, %v2325_v31, 0.0 }
 0x251   :  { %514 = vadd.xlane.f32.xlu0 %v513_v33 }
 0x252   :  { %v2331_v34 = vpop.f32.mrb[10].mxu1 }
 0x253   :  { %v2333_v36 = vpop.f32.mrb[11].mxu1  ;;  %v522_v37 = vsel %vm64_vm0, %v2331_v34, 0.0 }
 0x254   :  { %523 = vadd.xlane.f32.xlu1 %v522_v37  ;;  %v519_v40 = vsel %vm64_vm0, %v2333_v36, 0.0 }
 0x256   :  { %v1792_v38 = vpop.f32.mrb[12].mxu1 }
 0x257   :  { %v794_v39 = vpop.f32.mrb[13].mxu1 }
 0x258   :  { %1804 = vmatprep.mubr.msk.f32.mxu0 %vm64_vm0, %v794_v39  ;;  %520 = vadd.xlane.f32.xlu1 %v519_v40 }
 0x259   :  { %1805 = vmatmul.mubr.msk.f32.vlgmr.msra.gmra.mrb[8].mxu0 %vm64_vm0, %v1792_v38 }
 0x25a   :  { %v1795_v42 = vpop.f32.mrb[14].mxu1  ;;  %1827 = vmatpush3.bf16.msra.mxu0 %v1949_v29 }
 0x25b   :  { %v804_v43 = vpop.f32.mrb[15].mxu1  ;;  %1828 = vmatprep.subr.bf16.mxu0 %v1950_v41 }
 0x25c   :  { %1807 = vmatprep.mubr.msk.f32.mxu0 %vm64_vm0, %v804_v43 }
 0x25d   :  { %1808 = vmatmul.mubr.msk.f32.gmra.mrb[10].mxu0 %vm64_vm0, %v1795_v42 }
 0x25e   :  { %1829 = vmatpush3.bf16.msra.mxu0 %v1950_v41 }
 0x25f   :  { %1830 = vmatprep.subr.bf16.mxu0 %v1951_v44 }
 0x262   :  { %1831 = vmatpush3.bf16.msra.mxu0 %v1951_v44 }
 0x263   :  { %1832 = vmatprep.subr.bf16.mxu0 %v1952_v45 }
 0x266   :  { %v1820_v48 = vpop.f32.mrb[16].mxu1  ;;  %1833 = vmatpush3.bf16.msra.mxu0 %v1952_v45 }
 0x267   :  { %v2359_v17 = vadd.f32 %v1820_v48, %v1598_v47  ;;  %v1065_v49 = vpop.f32.mrb[17].mxu1  ;;  %1834 = vmatprep.subr.bf16.mxu0 %v1953_v46 }
 0x268   :  { %v2364_v51 = vadd.f32 %v1598_v47, %v1065_v49  ;;  %v1821_v52 = vpop.f32.mrb[18].mxu1 }
 0x269   :  { %v1098_v55 = vmul.f32 %v2359_v17, %v2359_v17  ;;  %v2368_v56 = vadd.f32 %v1821_v52, %v1598_v47  ;;  %v1068_v60 = vpop.f32.mrb[19].mxu1 }
 0x26a   :  { %v1096_v61 = vmul.f32 %v2364_v51, %v2364_v51  ;;  %v2376_v53 = vadd.f32 %v1598_v47, %v1068_v60  ;;  %1835 = vmatpush3.bf16.msra.mxu0 %v1953_v46 }
 0x26b   :  { %v1106_v62 = vmul.f32 %v1098_v55, %v2359_v17  ;;  %v1099_v63 = vmul.f32 %v2368_v56, %v2368_v56  ;;  %1836 = vmatprep.subr.bf16.mxu0 %v1954_v50 }
 0x26c   :  { %v1104_v2 = vmul.f32 %v1096_v61, %v2364_v51  ;;  %v1097_v3 = vmul.f32 %v2376_v53, %v2376_v53 }
 0x26d   :  { %v1114_v4 = vmul.f32 0.044715, %v1106_v62  ;;  %v1107_v5 = vmul.f32 %v1099_v63, %v2368_v56 }
 0x26e   :  { %v1112_v57 = vmul.f32 0.044715, %v1104_v2  ;;  %v1105_v6 = vmul.f32 %v1097_v3, %v2376_v53  ;;  %v1824_v7 = vpop.f32.mrb[20].mxu1  ;;  %1837 = vmatpush3.bf16.msra.mxu0 %v1954_v50 }
 0x26f   :  { %v1122_v8 = vadd.f32 %v1114_v4, %v2359_v17  ;;  %v1115_v10 = vmul.f32 0.044715, %v1107_v5  ;;  %v2390_v11 = vadd.f32 %v1824_v7, %v1619_v54  ;;  %v1081_v12 = vpop.f32.mrb[21].mxu1  ;;  %1838 = vmatprep.subr.bf16.mxu0 %v1955_v1 }
 0x270   :  { %v1120_v14 = vadd.f32 %v1112_v57, %v2364_v51  ;;  %v1113_v15 = vmul.f32 0.044715, %v1105_v6  ;;  %v2396_v16 = vadd.f32 %v1619_v54, %v1081_v12  ;;  %v1825_v18 = vpop.f32.mrb[22].mxu1 }
 0x271   :  { %v1130_v19 = vmul.f32 0.7978846, %v1122_v8  ;;  %v1123_v20 = vadd.f32 %v1115_v10, %v2368_v56  ;;  %v1102_v21 = vmul.f32 %v2390_v11, %v2390_v11  ;;  %v2401_v22 = vadd.f32 %v1825_v18, %v1619_v54  ;;  %v1084_v23 = vpop.f32.mrb[23].mxu1 }
 0x272   :  { %v1128_v24 = vmul.f32 0.7978846, %v1120_v14  ;;  %v1121_v25 = vadd.f32 %v1113_v15, %v2376_v53  ;;  %v1100_v26 = vmul.f32 %v2396_v16, %v2396_v16  ;;  %v2406_v27 = vadd.f32 %v1619_v54, %v1084_v23  ;;  %1839 = vmatpush3.bf16.msra.mxu0 %v1955_v1 }
 0x273   :  { %1957 = vtanh.f32 %v1130_v19  ;;  %v1131_v28 = vmul.f32 0.7978846, %v1123_v20  ;;  %v1110_v29 = vmul.f32 %v1102_v21, %v2390_v11  ;;  %v1103_v32 = vmul.f32 %v2401_v22, %v2401_v22  ;;  %1840 = vmatprep.subr.bf16.mxu0 %v1956_v58 }
 0x274   :  { %1959 = vtanh.f32 %v1128_v24  ;;  %v1129_v33 = vmul.f32 0.7978846, %v1121_v25  ;;  %v1108_v37 = vmul.f32 %v1100_v26, %v2396_v16  ;;  %v1101_v38 = vmul.f32 %v2406_v27, %v2406_v27 }
 0x275   :  { %1961 = vtanh.f32 %v1131_v28  ;;  %v1118_v39 = vmul.f32 0.044715, %v1110_v29  ;;  %v1111_v40 = vmul.f32 %v1103_v32, %v2401_v22 }
 0x276   :  { %1963 = vtanh.f32 %v1129_v33  ;;  %v1116_v41 = vmul.f32 0.044715, %v1108_v37  ;;  %v1109_v42 = vmul.f32 %v1101_v38, %v2406_v27  ;;  %1841 = vmatpush3.bf16.msra.mxu0 %v1956_v58 }
 0x277   :  { %v1126_v43 = vadd.f32 %v1118_v39, %v2390_v11  ;;  %v1119_v44 = vmul.f32 0.044715, %v1111_v40 }
 0x278   :  { %v1124_v45 = vadd.f32 %v1116_v41, %v2396_v16  ;;  %v1117_v46 = vmul.f32 0.044715, %v1109_v42 }
 0x279   :  { %v1134_v47 = vmul.f32 0.7978846, %v1126_v43  ;;  %v1127_v48 = vadd.f32 %v1119_v44, %v2401_v22 }
 0x27a   :  { %v1132_v49 = vmul.f32 0.7978846, %v1124_v45  ;;  %v1125_v50 = vadd.f32 %v1117_v46, %v2406_v27 }
 0x27b   :  { %1965 = vtanh.f32 %v1134_v47  ;;  %v1135_v52 = vmul.f32 0.7978846, %v1127_v48 }
 0x27c   :  { %1967 = vtanh.f32 %v1132_v49  ;;  %v1133_v55 = vmul.f32 0.7978846, %v1125_v50 }
 0x27d   :  { %v1958_v60 = vpop.eup %1957  ;;  %1969 = vtanh.f32 %v1135_v52 }
 0x27e   :  { %v1960_v61 = vpop.eup %1959  ;;  %v1146_v62 = vadd.f32 1.0, %v1958_v60  ;;  %1971 = vtanh.f32 %v1133_v55 }
 0x27f   :  { %v1962_v63 = vpop.eup %1961  ;;  %v1144_v1 = vadd.f32 1.0, %v1960_v61 }
 0x280   :  { %v1964_v2 = vpop.eup %1963  ;;  %v1154_v3 = vmul.f32 0.5, %v1146_v62  ;;  %v1147_v54 = vadd.f32 1.0, %v1962_v63 }
 0x281   :  { %v1145_v4 = vadd.f32 1.0, %v1964_v2  ;;  %v1152_v5 = vmul.f32 0.5, %v1144_v1 }
 0x282   :  { %v1155_v57 = vmul.f32 0.5, %v1147_v54  ;;  %v1162_v7 = vmul.f32 %v1154_v3, %v2359_v17 }
 0x283   :  { %v1153_v6 = vmul.f32 0.5, %v1145_v4  ;;  %v1160_v12 = vmul.f32 %v1152_v5, %v2364_v51 }
 0x284   :  { %v1163_v8 = vmul.f32 %v1155_v57, %v2368_v56 }
 0x285   :  { %v1966_v10 = vpop.eup %1965  ;;  %v1161_v58 = vmul.f32 %v1153_v6, %v2376_v53 }
 0x286   :  { %v1968_v14 = vpop.eup %1967  ;;  %v1169_v15 = vpack.c.bf16 %v1163_v8, %v1162_v7  ;;  %v1150_v18 = vadd.f32 1.0, %v1966_v10 }
 0x287   :  { %v1970_v19 = vpop.eup %1969  ;;  %v1168_v20 = vpack.c.bf16 %v1161_v58, %v1160_v12  ;;  %v1148_v21 = vadd.f32 1.0, %v1968_v14  ;;  %v2488_v12 = vpop.permute.xlu0 %970 }
 0x288   :  { %v1972_v23 = vpop.eup %1971  ;;  %v1151_v24 = vadd.f32 1.0, %v1970_v19  ;;  %v1158_v25 = vmul.f32 0.5, %v1150_v18 }
 0x289   :  { %1842 = vmatprep.mubr.bf16.mxu0 %v1168_v20  ;;  %v1149_v26 = vadd.f32 1.0, %v1972_v23  ;;  %v1156_v28 = vmul.f32 0.5, %v1148_v21 }
 0x28a   :  { %1843 = vmatmul.mubr.bf16.vlgmr.msra.gmra.mrb[12].mxu0 %v1169_v15  ;;  %v1159_v17 = vmul.f32 0.5, %v1151_v24  ;;  %v1166_v29 = vmul.f32 %v1158_v25, %v2390_v11 }
 0x28b   :  { %v1157_v56 = vmul.f32 0.5, %v1149_v26  ;;  %v1164_v53 = vmul.f32 %v1156_v28, %v2396_v16 }
 0x28c   :  { %v1167_v51 = vmul.f32 %v1159_v17, %v2401_v22 }
 0x28d   :  { %v1165_v32 = vmul.f32 %v1157_v56, %v2406_v27 }
 0x28e   :  { %v1171_v33 = vpack.c.bf16 %v1167_v51, %v1166_v29 }
 0x28f   :  { %v1170_v37 = vpack.c.bf16 %v1165_v32, %v1164_v53 }
 0x291   :  { %1846 = vmatprep.mubr.bf16.mxu0 %v1170_v37 }
 0x292   :  { %1847 = vmatmul.mubr.bf16.gmra.mrb[16].mxu0 %v1171_v33 }
 0x2dd   :  { %v518_v38 = vpop.xlane.xlu1 %517 }
 0x2de   :  { %v526_v39 = vadd.f32 1e-10, %v518_v38  ;;  %v515_v14 = vpop.xlane.xlu0 %514 }
 0x2e0   :  { %1973 = vrcp.f32 %v526_v39 }
 0x2e1   :  { %v524_v40 = vpop.xlane.xlu1 %523 }
 0x2e2   :  { %v528_v41 = vadd.f32 1e-10, %v524_v40 }
 0x2e4   :  { %1975 = vrcp.f32 %v528_v41 }
 0x2e5   :  { %v521_v54 = vpop.xlane.xlu1 %520 }
 0x2e6   :  { %v527_v8 = vadd.f32 1e-10, %v521_v54 }
 0x2e8   :  { %1977 = vrcp.f32 %v527_v8 }
 0x2ea   :  { %v1974_v42 = vpop.eup %1973 }
 0x2eb   :  { %v2429_v43 = vmul.f32 %v1974_v42, %v2323_v30  ;;  %v525_v42 = vadd.f32 1e-10, %v515_v14 }
 0x2ee   :  { %v1976_v11 = vpop.eup %1975 }
 0x2ef   :  { %v2432_v22 = vmul.f32 %v1976_v11, %v2331_v34 }
 0x2f2   :  { %v1978_v19 = vpop.eup %1977 }
 0x2f3   :  { %v535_v25 = vmul.f32 %v1978_v19, %v2333_v36 }
 0x32c   :  { %v2434_v16 = vpop.f32.mrb[8].mxu0 }
 0x32d   :  { %v2436_v27 = vpop.f32.mrb[9].mxu0  ;;  %v913_v44 = vsel %vm64_vm0, %v2434_v16, 0.0 }
 0x32e   :  { %914 = vadd.xlane.f32.xlu1 %v913_v44  ;;  %v910_v30 = vsel %vm64_vm0, %v2436_v27, 0.0 }
 0x330   :  { %v2440_v45 = vpop.f32.mrb[10].mxu0 }
 0x331   :  { %v2442_v46 = vpop.f32.mrb[11].mxu0  ;;  %v919_v34 = vsel %vm64_vm0, %v2440_v45, 0.0 }
 0x332   :  { %911 = vadd.xlane.f32.xlu1 %v910_v30  ;;  %v916_v47 = vsel %vm64_vm0, %v2442_v46, 0.0 }
 0x336   :  { %920 = vadd.xlane.f32.xlu1 %v919_v34 }
 0x33a   :  { %917 = vadd.xlane.f32.xlu1 %v916_v47 }
 0x35d   :  { %v1844_v48 = vpop.f32.mrb[12].mxu0 }
 0x35e   :  { %1313 = vrot.lane.b32.xlu0 %v1844_v48, %s2055_s10  ;;  %v2451_v49 = vpop.f32.mrb[13].mxu0  ;;  %v1381_v63 = vsel %vm64_vm0, %v1844_v48, -inf }
 0x35f   :  { %v2453_v50 = vpop.f32.mrb[14].mxu0  ;;  %v1375_v1 = vsel %vm64_vm0, %v2451_v49, -inf }
 0x360   :  { %v2455_v52 = vpop.f32.mrb[15].mxu0  ;;  %v1384_v2 = vsel %vm64_vm0, %v2453_v50, -inf }
 0x361   :  { %1311 = vrot.lane.b32.xlu1 %v2455_v52, %s2055_s10  ;;  %v1378_v3 = vsel %vm64_vm0, %v2455_v52, -inf }
 0x365   :  { %v2459_v55 = vpop.f32.mrb[16].mxu0 }
 0x366   :  { %v2461_v60 = vpop.f32.mrb[17].mxu0  ;;  %v1393_v4 = vsel %vm64_vm0, %v2459_v55, -inf }
 0x367   :  { %v2463_v61 = vpop.f32.mrb[18].mxu0  ;;  %v1387_v57 = vsel %vm64_vm0, %v2461_v60, -inf }
 0x368   :  { %v2465_v62 = vpop.f32.mrb[19].mxu0  ;;  %v1396_v6 = vsel %vm64_vm0, %v2463_v61, -inf }
 0x369   :  { %v1390_v10 = vsel %vm64_vm0, %v2465_v62, -inf }
 0x37d   :  { %1382 = vmax.xlane.f32.xlu0 %v1381_v63 }
 0x393   :  { %1309 = vrot.lane.b32.xlu0 %v2451_v49, %s2055_s10 }
 0x3b2   :  { %1376 = vmax.xlane.f32.xlu0 %v1375_v1 }
 0x3bb   :  { %v2480_v5 = vpop.xlane.xlu1 %914 }
 0x3bf   :  { %v912_v7 = vpop.xlane.xlu1 %911 }
 0x3c3   :  { %v921_v58 = vpop.xlane.xlu1 %920 }
 0x3c7   :  { %v918_v15 = vpop.xlane.xlu1 %917 }
 0x3c8   :  { %1315 = vrot.lane.b32.xlu0 %v2453_v50, %s2055_s10 }
 0x3d0   :  { %v1314_v18 = vpop.permute.xlu0 %1313 }
 0x3d1   :  { %v1335_v26 = vsub.f32 %v2267_v13, %v1314_v18  ;;  %v923_v18 = vadd.f32 1e-10, %v2480_v5 }
 0x3d3   :  { %v1312_v20 = vpop.permute.xlu1 %1311  ;;  %v1343_v32 = vmul.f32 %v1335_v26, %v1335_v26 }
 0x3d4   :  { %v1334_v23 = vsub.f32 %v2241_v59, %v1312_v20 }
 0x3d5   :  { %v1353_v39 = vsel %vm1349_vm10, %v1343_v32, 0.0 }
 0x3d6   :  { %v1342_v29 = vmul.f32 %v1334_v23, %v1334_v23 }
 0x3d8   :  { %v1351_v36 = vsel %vm1349_vm10, %v1342_v29, 0.0 }
 0x3e7   :  { %1385 = vmax.xlane.f32.xlu0 %v1384_v2 }
 0x3eb   :  { %1379 = vmax.xlane.f32.xlu0 %v1378_v3 }
 0x3ef   :  { %1394 = vmax.xlane.f32.xlu0 %v1393_v4 }
 0x3f3   :  { %1388 = vmax.xlane.f32.xlu0 %v1387_v57  ;;  %v922_v57 = vadd.f32 1e-10, %v912_v7 }
 0x3f7   :  { %1397 = vmax.xlane.f32.xlu0 %v1396_v6 }
 0x3fb   :  { %1391 = vmax.xlane.f32.xlu0 %v1390_v10 }
 0x40a   :  { %v1383_v21 = vpop.xlane.xlu0 %1382 }
 0x40b   :  { %v1401_v24 = vsub.f32 %v1844_v48, %v1383_v21 }
 0x40d   :  { %v1411_v28 = vmul.f32 1.442695, %v1401_v24  ;;  %v1457_v17 = vmul.f32 %v1401_v24, %v535_v25 }
 0x40e   :  { %v1310_v56 = vpop.permute.xlu0 %1309 }
 0x40f   :  { %1979 = vpow2.f32 %v1411_v28  ;;  %v1333_v51 = vsub.f32 %v2253_v0, %v1310_v56  ;;  %v1469_v53 = vsel %vm64_vm0, %v1457_v17, 0.0 }
 0x410   :  { %1470 = vadd.xlane.f32.xlu1 %v1469_v53  ;;  %1981 = vrcp.f32 %v525_v42 }
 0x411   :  { %v1341_v33 = vmul.f32 %v1333_v51, %v1333_v51  ;;  %1317 = vrot.lane.b32.xlu0 %v2461_v60, %s2055_s10 }
 0x413   :  { %v1350_v37 = vsel %vm1349_vm10, %v1341_v33, 0.0 }
 0x414   :  { %v1352_v38 = vadd.f32 %v1351_v36, %v1350_v37 }
 0x415   :  { %972 = vrot.lane.b32.xlu0 %v2241_v59, %s2054_s2 }
 0x416   :  { %v1354_v0 = vadd.f32 %v1353_v39, %v1352_v38 }
 0x419   :  { %v1980_v40 = vpop.eup %1979  ;;  %1319 = vrot.lane.b32.xlu0 %v2465_v62, %s2055_s10 }
 0x41a   :  { %v2504_v41 = vmul.f32 %v1980_v40, %v535_v25  ;;  %v1982_v11 = vpop.eup %1981 }
 0x41b   :  { %v533_v59 = vmul.f32 %v1982_v11, %v2325_v31  ;;  %v925_v31 = vadd.f32 1e-10, %v921_v58 }
 0x41d   :  { %974 = vrot.lane.b32.xlu0 %v2267_v13, %s2054_s2 }
 0x421   :  { %1321 = vrot.lane.b32.xlu0 %v2459_v55, %s2055_s10 }
 0x43f   :  { %v1377_v44 = vpop.xlane.xlu0 %1376 }
 0x440   :  { %v1399_v30 = vsub.f32 %v2451_v49, %v1377_v44  ;;  %v924_v49 = vadd.f32 1e-10, %v918_v15 }
 0x442   :  { %v1407_v34 = vmul.f32 1.442695, %v1399_v30  ;;  %v1455_v47 = vmul.f32 %v1399_v30, %v533_v59 }
 0x443   :  { %v1316_v48 = vpop.permute.xlu0 %1315 }
 0x444   :  { %1983 = vpow2.f32 %v1407_v34  ;;  %v1336_v63 = vsub.f32 %v2262_v9, %v1316_v48  ;;  %v1463_v1 = vsel %vm64_vm0, %v1455_v47, 0.0  ;;  %v1437_v47 = vsel %vm64_vm0, %v2504_v41, 0.0 }
 0x445   :  { %1464 = vadd.xlane.f32.xlu1 %v1463_v1  ;;  %1985 = vrcp.f32 %v924_v49 }
 0x446   :  { %v1344_v13 = vmul.f32 %v1336_v63, %v1336_v63  ;;  %1987 = vrcp.f32 %v922_v57 }
 0x447   :  { %1989 = vrcp.f32 %v925_v31 }
 0x448   :  { %v1355_v2 = vsel %vm1349_vm10, %v1344_v13, 0.0 }
 0x449   :  { %v2515_v3 = vadd.f32 %v1355_v2, %v1354_v0 }
 0x44e   :  { %v1984_v54 = vpop.eup %1983 }
 0x44f   :  { %v2517_v4 = vmul.f32 %v1984_v54, %v533_v59  ;;  %v1986_v15 = vpop.eup %1985 }
 0x450   :  { %v932_v5 = vmul.f32 %v1986_v15, %v2442_v46  ;;  %v1988_v25 = vpop.eup %1987 }
 0x451   :  { %v930_v29 = vmul.f32 %v1988_v25, %v2436_v27  ;;  %v1990_v51 = vpop.eup %1989 }
 0x452   :  { %v933_v38 = vmul.f32 %v1990_v51, %v2440_v45 }
 0x474   :  { %v1386_v6 = vpop.xlane.xlu0 %1385 }
 0x475   :  { %v1402_v8 = vsub.f32 %v2453_v50, %v1386_v6 }
 0x477   :  { %v1413_v10 = vmul.f32 1.442695, %v1402_v8  ;;  %v1458_v14 = vmul.f32 %v1402_v8, %v2432_v22 }
 0x478   :  { %v1380_v19 = vpop.xlane.xlu0 %1379 }
 0x479   :  { %1991 = vpow2.f32 %v1413_v10  ;;  %v1400_v20 = vsub.f32 %v2455_v52, %v1380_v19  ;;  %v1472_v21 = vsel %vm64_vm0, %v1458_v14, 0.0 }
 0x47a   :  { %1473 = vadd.xlane.f32.xlu0 %v1472_v21  ;;  %1993 = vrcp.f32 %v923_v18 }
 0x47b   :  { %v1409_v7 = vmul.f32 1.442695, %v1400_v20  ;;  %v1456_v58 = vmul.f32 %v1400_v20, %v2429_v43 }
 0x47c   :  { %v1395_v23 = vpop.xlane.xlu0 %1394 }
 0x47d   :  { %1995 = vpow2.f32 %v1409_v7  ;;  %v1405_v50 = vsub.f32 %v2459_v55, %v1395_v23  ;;  %v1466_v24 = vsel %vm64_vm0, %v1456_v58, 0.0 }
 0x47e   :  { %1467 = vadd.xlane.f32.xlu0 %v1466_v24 }
 0x47f   :  { %v1419_v26 = vmul.f32 1.442695, %v1405_v50  ;;  %v1461_v52 = vmul.f32 %v1405_v50, %v932_v5 }
 0x480   :  { %v1389_v28 = vpop.xlane.xlu0 %1388 }
 0x481   :  { %1997 = vpow2.f32 %v1419_v26  ;;  %v1403_v17 = vsub.f32 %v2461_v60, %v1389_v28  ;;  %v1481_v56 = vsel %vm64_vm0, %v1461_v52, 0.0 }
 0x482   :  { %1482 = vadd.xlane.f32.xlu1 %v1481_v56 }
 0x483   :  { %v1992_v53 = vpop.eup %1991  ;;  %v1415_v55 = vmul.f32 1.442695, %v1403_v17  ;;  %v1459_v32 = vmul.f32 %v1403_v17, %v930_v29 }
 0x484   :  { %v1398_v33 = vpop.xlane.xlu0 %1397  ;;  %v1426_v46 = vmul.f32 %v1992_v53, %v2432_v22  ;;  %v1994_v60 = vpop.eup %1993 }
 0x485   :  { %1999 = vpow2.f32 %v1415_v55  ;;  %v1406_v36 = vsub.f32 %v2463_v61, %v1398_v33  ;;  %v1475_v37 = vsel %vm64_vm0, %v1459_v32, 0.0  ;;  %v931_v44 = vmul.f32 %v1994_v60, %v2434_v16 }
 0x486   :  { %1476 = vadd.xlane.f32.xlu1 %v1475_v37  ;;  %v1440_v16 = vsel %vm64_vm0, %v1426_v46, 0.0 }
 0x487   :  { %v1996_v39 = vpop.eup %1995  ;;  %v1421_v0 = vmul.f32 1.442695, %v1406_v36  ;;  %v1462_v27 = vmul.f32 %v1406_v36, %v933_v38 }
 0x488   :  { %v1392_v40 = vpop.xlane.xlu0 %1391  ;;  %v1424_v42 = vmul.f32 %v1996_v39, %v2429_v43 }
 0x489   :  { %2001 = vpow2.f32 %v1421_v0  ;;  %v1404_v11 = vsub.f32 %v2465_v62, %v1392_v40  ;;  %v1484_v22 = vsel %vm64_vm0, %v1462_v27, 0.0  ;;  %v1431_v62 = vsel %vm64_vm0, %v2517_v4, 0.0 }
 0x48a   :  { %1485 = vadd.xlane.f32.xlu1 %v1484_v22  ;;  %v1434_v54 = vsel %vm64_vm0, %v1424_v42, 0.0 }
 0x48b   :  { %v1998_v30 = vpop.eup %1997  ;;  %v1417_v59 = vmul.f32 1.442695, %v1404_v11  ;;  %v1460_v34 = vmul.f32 %v1404_v11, %v931_v44 }
 0x48c   :  { %v1429_v45 = vmul.f32 %v1998_v30, %v932_v5  ;;  %v1318_v6 = vpop.permute.xlu0 %1317 }
 0x48d   :  { %2003 = vpow2.f32 %v1417_v59  ;;  %v1478_v48 = vsel %vm64_vm0, %v1460_v34, 0.0  ;;  %v1337_v17 = vsub.f32 %v2488_v12, %v1318_v6 }
 0x48e   :  { %1438 = vadd.xlane.f32.xlu1 %v1437_v47  ;;  %1479 = vadd.xlane.f32.xlu0 %v1478_v48  ;;  %v1449_v2 = vsel %vm64_vm0, %v1429_v45, 0.0 }
 0x48f   :  { %v2000_v43 = vpop.eup %1999  ;;  %v1345_v32 = vmul.f32 %v1337_v17, %v1337_v17 }
 0x490   :  { %v1427_v63 = vmul.f32 %v2000_v43, %v930_v29  ;;  %v973_v8 = vpop.permute.xlu0 %972 }
 0x491   :  { %v1357_v39 = vsel %vm1349_vm10, %v1345_v32, 0.0 }
 0x492   :  { %1432 = vadd.xlane.f32.xlu1 %v1431_v62  ;;  %1441 = vadd.xlane.f32.xlu0 %v1440_v16  ;;  %v1443_v57 = vsel %vm64_vm0, %v1427_v63, 0.0  ;;  %v1358_v22 = vadd.f32 %v1357_v39, %v2515_v3 }
 0x493   :  { %v2002_v1 = vpop.eup %2001 }
 0x494   :  { %v1430_v13 = vmul.f32 %v2002_v1, %v933_v38  ;;  %v1320_v10 = vpop.permute.xlu0 %1319 }
 0x495   :  { %v1338_v29 = vsub.f32 %v973_v8, %v1320_v10 }
 0x496   :  { %1450 = vadd.xlane.f32.xlu1 %v1449_v2  ;;  %1435 = vadd.xlane.f32.xlu0 %v1434_v54  ;;  %v1452_v31 = vsel %vm64_vm0, %v1430_v13, 0.0 }
 0x497   :  { %v2004_v41 = vpop.eup %2003  ;;  %v1346_v37 = vmul.f32 %v1338_v29, %v1338_v29 }
 0x498   :  { %v1428_v49 = vmul.f32 %v2004_v41, %v931_v44  ;;  %v975_v14 = vpop.permute.xlu0 %974 }
 0x499   :  { %v1359_v40 = vsel %vm1349_vm10, %v1346_v37, 0.0 }
 0x49a   :  { %1444 = vadd.xlane.f32.xlu1 %v1443_v57  ;;  %1453 = vadd.xlane.f32.xlu0 %v1452_v31  ;;  %v1446_v4 = vsel %vm64_vm0, %v1428_v49, 0.0  ;;  %v1360_v48 = vadd.f32 %v1359_v40, %v1358_v22 }
 0x49c   :  { %v1322_v20 = vpop.permute.xlu0 %1321 }
 0x49d   :  { %v2554_v18 = vpop.xlane.xlu1 %1470  ;;  %v1339_v33 = vsub.f32 %v975_v14, %v1322_v20 }
 0x49e   :  { %1447 = vadd.xlane.f32.xlu0 %v1446_v4 }
 0x49f   :  { %v1347_v0 = vmul.f32 %v1339_v33, %v1339_v33 }
 0x4a1   :  { %v1361_v59 = vsel %vm1349_vm10, %v1347_v0, 0.0 }
 0x4a2   :  { %v1362_v1 = vadd.f32 %v1361_v59, %v1360_v48 }
 0x4ab   :  { %1323 = vrot.lane.b32.xlu1 %v2463_v61, %s2055_s10 }
 0x4b4   :  { %976 = vrot.lane.b32.xlu0 %v2262_v9, %s2054_s2 }
 0x4d2   :  { %v2556_v19 = vpop.xlane.xlu1 %1464 }
 0x507   :  { %v2560_v15 = vpop.xlane.xlu0 %1473 }
 0x50b   :  { %v1468_v58 = vpop.xlane.xlu0 %1467 }
 0x50f   :  { %v2558_v21 = vpop.xlane.xlu1 %1482 }
 0x513   :  { %v2562_v7 = vpop.xlane.xlu1 %1476 }
 0x517   :  { %v2564_v61 = vpop.xlane.xlu1 %1485 }
 0x51b   :  { %v1439_v23 = vpop.xlane.xlu1 %1438  ;;  %v2566_v9 = vpop.xlane.xlu0 %1479 }
 0x51c   :  { %v1489_v50 = vadd.f32 1e-10, %v1439_v23 }
 0x51f   :  { %v1433_v24 = vpop.xlane.xlu1 %1432  ;;  %v1442_v5 = vpop.xlane.xlu0 %1441 }
 0x520   :  { %v1487_v25 = vadd.f32 1e-10, %v1433_v24  ;;  %v1490_v26 = vadd.f32 1e-10, %v1442_v5 }
 0x522   :  { %2005 = vlog2.f32 %v1487_v25 }
 0x523   :  { %2007 = vlog2.f32 %v1489_v50  ;;  %v1451_v52 = vpop.xlane.xlu1 %1450  ;;  %v1436_v28 = vpop.xlane.xlu0 %1435 }
 0x524   :  { %v1488_v56 = vadd.f32 1e-10, %v1436_v28  ;;  %2009 = vlog2.f32 %v1490_v26  ;;  %v1493_v51 = vadd.f32 1e-10, %v1451_v52 }
 0x526   :  { %2011 = vlog2.f32 %v1488_v56 }
 0x527   :  { %v1445_v53 = vpop.xlane.xlu1 %1444  ;;  %v1454_v55 = vpop.xlane.xlu0 %1453 }
 0x528   :  { %v1491_v46 = vadd.f32 1e-10, %v1445_v53  ;;  %v1494_v36 = vadd.f32 1e-10, %v1454_v55 }
 0x52a   :  { %2013 = vlog2.f32 %v1491_v46 }
 0x52b   :  { %2015 = vlog2.f32 %v1493_v51  ;;  %v1448_v38 = vpop.xlane.xlu0 %1447  ;;  %v1324_v44 = vpop.permute.xlu1 %1323 }
 0x52c   :  { %v2006_v60 = vpop.eup %2005  ;;  %v1492_v12 = vadd.f32 1e-10, %v1448_v38  ;;  %2017 = vlog2.f32 %v1494_v36 }
 0x52d   :  { %v2008_v27 = vpop.eup %2007  ;;  %v1496_v42 = vmul.f32 0.6931472, %v2006_v60 }
 0x52e   :  { %2019 = vlog2.f32 %v1492_v12  ;;  %v2010_v11 = vpop.eup %2009  ;;  %v1500_v34 = vmul.f32 0.6931472, %v2008_v27 }
 0x52f   :  { %v977_v30 = vpop.permute.xlu0 %976  ;;  %v1511_v43 = vsub.f32 %v1496_v42, %v2556_v19  ;;  %v1502_v63 = vmul.f32 0.6931472, %v2010_v11 }
 0x530   :  { %v1340_v45 = vsub.f32 %v977_v30, %v1324_v44  ;;  %v2012_v47 = vpop.eup %2011  ;;  %v1513_v2 = vsub.f32 %v1500_v34, %v2554_v18 }
 0x531   :  { %v1498_v62 = vmul.f32 0.6931472, %v2012_v47  ;;  %v1519_v31 = vsel %vm1349_vm10, %v1511_v43, 0.0  ;;  %v1514_v4 = vsub.f32 %v1502_v63, %v2560_v15 }
 0x532   :  { %v1348_v16 = vmul.f32 %v1340_v45, %v1340_v45  ;;  %v1522_v19 = vsel %vm1349_vm10, %v1513_v2, 0.0 }
 0x533   :  { %v1512_v54 = vsub.f32 %v1498_v62, %v1468_v58  ;;  %v1524_v50 = vsel %vm1349_vm10, %v1514_v4, 0.0 }
 0x534   :  { %v2014_v13 = vpop.eup %2013  ;;  %v1363_v3 = vsel %vm1349_vm10, %v1348_v16, 0.0 }
 0x535   :  { %v2016_v41 = vpop.eup %2015  ;;  %v1504_v49 = vmul.f32 0.6931472, %v2014_v13  ;;  %v1364_v57 = vadd.f32 %v1363_v3, %v1362_v1  ;;  %v1520_v6 = vsel %vm1349_vm10, %v1512_v54, 0.0 }
 0x536   :  { %v2018_v8 = vpop.eup %2017  ;;  %v1521_v10 = vadd.f32 %v1520_v6, %v1519_v31  ;;  %v1508_v20 = vmul.f32 0.6931472, %v2016_v41 }
 0x537   :  { %1365 = vadd.xlane.f32.xlu0 %v1364_v57  ;;  %v1515_v18 = vsub.f32 %v1504_v49, %v2562_v7  ;;  %v1510_v24 = vmul.f32 0.6931472, %v2018_v8 }
 0x538   :  { %v2020_v14 = vpop.eup %2019  ;;  %v1523_v58 = vadd.f32 %v1522_v19, %v1521_v10  ;;  %v1517_v15 = vsub.f32 %v1508_v20, %v2558_v21 }
 0x539   :  { %v1506_v23 = vmul.f32 0.6931472, %v2020_v14  ;;  %v1526_v26 = vsel %vm1349_vm10, %v1515_v18, 0.0  ;;  %v1518_v17 = vsub.f32 %v1510_v24, %v2564_v61 }
 0x53a   :  { %v1525_v25 = vadd.f32 %v1524_v50, %v1523_v58  ;;  %v1530_v7 = vsel %vm1349_vm10, %v1517_v15, 0.0 }
 0x53b   :  { %v1516_v5 = vsub.f32 %v1506_v23, %v2566_v9  ;;  %v1532_v51 = vsel %vm1349_vm10, %v1518_v17, 0.0 }
 0x53c   :  { %v1527_v52 = vadd.f32 %v1526_v26, %v1525_v25 }
 0x53d   :  { %v1528_v28 = vsel %vm1349_vm10, %v1516_v5, 0.0 }
 0x53e   :  { %v1529_v56 = vadd.f32 %v1528_v28, %v1527_v52 }
 0x540   :  { %v1531_v29 = vadd.f32 %v1530_v7, %v1529_v56 }
 0x542   :  { %v1533_v53 = vadd.f32 %v1532_v51, %v1531_v29 }
 0x544   :  { %1534 = vadd.xlane.f32.xlu1 %v1533_v53 }
 0x5c4   :  { %v1366_v55 = vpop.xlane.xlu0 %1365 }
 0x5c5   :  { %v1367_v9 = vrot.slane %v1366_v55, 4 }
 0x5c7   :  { %v1368_v32 = vadd.f32 %v1367_v9, %v1366_v55 }
 0x5c9   :  { %v1369_v33 = vrot.slane %v1368_v32, 2 }
 0x5cb   :  { %v1370_v21 = vadd.f32 %v1369_v33, %v1368_v32 }
 0x5cd   :  { %v1371_v46 = vrot.slane %v1370_v21, 1 }
 0x5cf   :  { %v1372_v36 = vadd.f32 %v1371_v46, %v1370_v21 }
 0x5d1   :  { %1906 = vpush %v1372_v36  ;;  %v1535_v37 = vpop.xlane.xlu1 %1534 }
 0x5d2   :  { %v1536_v38 = vrot.slane %v1535_v37, 4 }
 0x5d4   :  { %v1537_v60 = vadd.f32 %v1536_v38, %v1535_v37 }
 0x5d6   :  { %v1538_v61 = vrot.slane %v1537_v60, 2 }
 0x5d8   :  { %v1539_v39 = vadd.f32 %v1538_v61, %v1537_v60 }
 0x5da   :  { %v1540_v0 = vrot.slane %v1539_v39, 1 }
 0x5dc   :  { %v1541_v12 = vadd.f32 %v1540_v0, %v1539_v39 }
 0x5de   :  { %1908 = vpush %v1541_v12 }
 0x602   :  { %s1907_s2 = spop %1906 }
 0x603   :  { %s1374_s28 = smul.f32 0.015625, %s1907_s2 }
 0x605   :  { %v1551_v40 = vstv %s1374_s28 }
 0x60f   :  { %s1909_s26 = spop %1908 }
 0x610   :  { %s1543_s27 = smul.f32 0.015625, %s1909_s26 }
 0x612   :  { %s1544_s9 = smul.f32 50.0, %s1543_s27 }
 0x614   :  { %s1545_s29 = sadd.f32 %s1544_s9, %s1374_s28  ;;  %v1549_v27 = vstv %s1544_s9 }
 0x615   :  { %v1550_v42 = vsel %vm1548_vm11, %v1549_v27, 0.0 }
 0x616   :  { %v1552_v11 = vsel %vm1547_vm12, %v1551_v40, %v1550_v42  ;;  %v1553_v22 = vstv %s1545_s29 }
 0x617   :  { %v1554_v44 = vsel %vm1546_vm13, %v1553_v22, %v1552_v11 }
 0x618   :  { %1555 = vst [vmem:[%s2606_s11] sm:$0x1] %v1554_v44 }
 0x619   :  { %1560 = vsyncpa [#allocation5], 1 }

</bundles_post_ra>
